<compile_context>
chip_gen: v5e
topology: v5e:2x2
jax: 0.10.0
libtpu: 0.0.40
codegen_flags: <defaults>
</compile_context>

<pallas_src>
import numpy as np
import jax
import jax.numpy as jnp
from jax import lax
from jax.experimental import pallas as pl
from jax.experimental.pallas import tpu as pltpu

BN_EPS = 1e-5
VMEM = pl.BlockSpec(memory_space=pltpu.MemorySpace.VMEM)


# -----------------------------------------------------------------------------
# Fused kernel
# -----------------------------------------------------------------------------
def _lenet_kernel(x_ref,
                  w1_ref, r1_ref, r1t_ref, g1_ref, b1_ref, s1e_ref, s1o_ref,
                  w2_ref, r2_ref, r2t_ref, g2_ref, b2_ref, s2e_ref, s2o_ref,
                  wf1_ref, gf1_ref, bf1_ref,
                  wf2_ref, bf2_ref,
                  wf3_ref, bf3_ref,
                  out_ref,
                  wp1_s, p1_s, wp2_s, hp_s):
    f32 = jnp.float32
    dot = lambda a, b: jnp.dot(a, b, preferred_element_type=f32)
    B = x_ref.shape[0] // 28

    # ---- conv1: ONE K=140 matmul -> dense [B*24, 144], rows=(b,oh), lanes=(ow,c) --------
    xc1 = jnp.concatenate(
        [jnp.concatenate([x_ref[b * 28 + kh: b * 28 + kh + 24, :] for kh in range(5)],
                         axis=1)
         for b in range(B)], axis=0)                                    # [B*24, 140]
    y1 = dot(xc1, w1_ref[...])                                          # [B*24, 144]

    # ---- bn_conv1 (batch stats, one pass) + ReLU ----------------------------------------
    n1 = float(B * 24 * 24)
    m1 = dot(jnp.sum(y1, axis=0, keepdims=True), r1_ref[...]) / n1      # [1, 6] mean
    q1 = dot(jnp.sum(y1 * y1, axis=0, keepdims=True), r1_ref[...]) / n1  # [1, 6] E[x^2]
    sc1 = lax.rsqrt(q1 - m1 * m1 + BN_EPS) * g1_ref[...]
    sh1 = b1_ref[...] - m1 * sc1                       # conv1 bias cancels under batch BN
    a1 = jnp.maximum(y1 * dot(sc1, r1t_ref[...]) + dot(sh1, r1t_ref[...]), 0.0)

    # ---- 2x2 max-pool #1 -> [B*12, 72]; width = 2 gather-dots, height = stride-2 rows ---
    wp1_s[...] = jnp.maximum(dot(a1, s1e_ref[...]), dot(a1, s1o_ref[...]))
    p1_s[...] = jnp.maximum(wp1_s[pl.ds(0, B * 12, stride=2), :],
                            wp1_s[pl.ds(1, B * 12, stride=2), :])

    # ---- conv2: ONE K=360 matmul -> dense [B*8, 128], rows=(b,oh2), lanes=(ow2,co) ------
    xc2 = jnp.concatenate(
        [jnp.concatenate([p1_s[b * 12 + kh: b * 12 + kh + 8, :] for kh in range(5)],
                         axis=1)
         for b in range(B)], axis=0)                                    # [B*8, 360]
    y2 = dot(xc2, w2_ref[...])                                          # [B*8, 128]

    # ---- bn_conv2 (batch stats) + ReLU ---------------------------------------------------
    n2 = float(B * 8 * 8)
    m2 = dot(jnp.sum(y2, axis=0, keepdims=True), r2_ref[...]) / n2      # [1, 16]
    q2 = dot(jnp.sum(y2 * y2, axis=0, keepdims=True), r2_ref[...]) / n2
    sc2 = lax.rsqrt(q2 - m2 * m2 + BN_EPS) * g2_ref[...]
    sh2 = b2_ref[...] - m2 * sc2                       # conv2 bias cancels under batch BN
    a2 = jnp.maximum(y2 * dot(sc2, r2t_ref[...]) + dot(sh2, r2t_ref[...]), 0.0)

    # ---- 2x2 max-pool #2 -> [B*4, 64] ----------------------------------------------------
    wp2_s[...] = jnp.maximum(dot(a2, s2e_ref[...]), dot(a2, s2o_ref[...]))
    hp_s[...] = jnp.maximum(wp2_s[pl.ds(0, B * 4, stride=2), :],
                            wp2_s[pl.ds(1, B * 4, stride=2), :])

    # ---- flatten to [B, 256] (lane order (h, w, c)) and fc1 as ONE K=256 matmul ---------
    x3 = jnp.concatenate([hp_s[pl.ds(h, B, stride=4), :] for h in range(4)], axis=1)
    h1 = dot(x3, wf1_ref[...])                         # fc1 bias cancels under bn_fc1

    # ---- bn_fc1 (batch stats) + ReLU -----------------------------------------------------
    m3 = jnp.sum(h1, axis=0, keepdims=True) / float(B)
    v3 = jnp.sum(h1 * h1, axis=0, keepdims=True) / float(B) - m3 * m3
    a3 = jnp.maximum((h1 - m3) * lax.rsqrt(v3 + BN_EPS) * gf1_ref[...] + bf1_ref[...], 0.0)

    # ---- fc2 + ReLU, fc_logits, softmax / log_softmax ------------------------------------
    feas = jnp.maximum(dot(a3, wf2_ref[...]) + bf2_ref[...], 0.0)       # [B, 84]
    logits = dot(feas, wf3_ref[...]) + bf3_ref[...]                     # [B, 10]
    z = logits - jnp.max(logits, axis=1, keepdims=True)
    e = jnp.exp(z)
    den = jnp.sum(e, axis=1, keepdims=True)
    pred = e / den
    logp = z - jnp.log(den)

    # ---- single lane-dense packed output: [logp(10)|pred(10)|logits(10)|feas(84)|pad(14)]
    pad = jnp.zeros((logits.shape[0], 128 - 114), f32)
    out_ref[...] = jnp.concatenate([logp, pred, logits, feas, pad], axis=1)


# -----------------------------------------------------------------------------
# Host-side constant / weight-layout helpers (pure data movement, done once)
# -----------------------------------------------------------------------------
def _fold_mats(nw, nc):
    # Fold (w, c) lanes -> per-channel c (R), and the expansion back (R^T).
    r = np.zeros((nw * nc, nc), np.float32)
    for w in range(nw):
        r[w * nc + np.arange(nc), np.arange(nc)] = 1.0
    return jnp.asarray(r), jnp.asarray(np.ascontiguousarray(r.T))


def _width_pool_selectors(nw_in, nc):
    # Gather lanes (2w, c) / (2w+1, c) -> (w, c); max of the two = width max-pool.
    nw_out = nw_in // 2
    se = np.zeros((nw_in * nc, nw_out * nc), np.float32)
    so = np.zeros((nw_in * nc, nw_out * nc), np.float32)
    for w in range(nw_out):
        se[(2 * w) * nc + np.arange(nc), w * nc + np.arange(nc)] = 1.0
        so[(2 * w + 1) * nc + np.arange(nc), w * nc + np.arange(nc)] = 1.0
    return jnp.asarray(se), jnp.asarray(so)


def _conv1_banded(w):      # w: [6, 1, 5, 5] -> [140, 144]
    # W[kh*28 + iw, ow*6 + c] = w[c, 0, kh, iw-ow]  for 0 <= iw-ow < 5
    kh, kw, ow, c = np.meshgrid(np.arange(5), np.arange(5), np.arange(24),
                                np.arange(6), indexing="ij")
    rows = (kh * 28 + ow + kw).ravel()
    cols = (ow * 6 + c).ravel()
    vals = w[c.ravel(), 0, kh.ravel(), kw.ravel()]
    return jnp.zeros((140, 144), jnp.float32).at[rows, cols].set(vals)


def _conv2_banded(w):      # w: [16, 6, 5, 5] -> [360, 128]
    # W[kh*72 + (ow2+kw)*6 + ci, ow2*16 + co] = w[co, ci, kh, kw]
    kh, kw, ow, ci, co = np.meshgrid(np.arange(5), np.arange(5), np.arange(8),
                                     np.arange(6), np.arange(16), indexing="ij")
    rows = (kh * 72 + (ow + kw) * 6 + ci).ravel()
    cols = (ow * 16 + co).ravel()
    vals = w[co.ravel(), ci.ravel(), kh.ravel(), kw.ravel()]
    return jnp.zeros((360, 128), jnp.float32).at[rows, cols].set(vals)


# -----------------------------------------------------------------------------
# Wrapper
# -----------------------------------------------------------------------------
def lenet_bn_forward(x, p):
    B = x.shape[0]
    x_rows = x[:, 0].reshape(B * 28, 28)                     # rows=(b, ih), lanes=iw

    w1b = _conv1_banded(p["conv1_w"])
    w2b = _conv2_banded(p["conv2_w"])
    r1, r1t = _fold_mats(24, 6)
    r2, r2t = _fold_mats(8, 16)
    s1e, s1o = _width_pool_selectors(24, 6)
    s2e, s2o = _width_pool_selectors(8, 16)
    # fc1 columns: PyTorch NCHW flatten order (c, h, w) -> kernel lane order (h, w, c).
    wf1 = jnp.transpose(p["fc1_w"].reshape(120, 16, 4, 4), (2, 3, 1, 0)).reshape(256, 120)
    r2d = lambda a: a.reshape(1, -1)

    packed = pl.pallas_call(
        _lenet_kernel,
        out_shape=jax.ShapeDtypeStruct((B, 128), jnp.float32),
        in_specs=[VMEM] * 22,
        out_specs=VMEM,
        scratch_shapes=[
            pltpu.VMEM((B * 24, 72), jnp.float32),   # width-pooled conv1 activations
            pltpu.VMEM((B * 12, 72), jnp.float32),   # pool1 output
            pltpu.VMEM((B * 8, 64), jnp.float32),    # width-pooled conv2 activations
            pltpu.VMEM((B * 4, 64), jnp.float32),    # pool2 output
        ],
    )(x_rows,
      w1b, r1, r1t, r2d(p["bn1_g"]), r2d(p["bn1_b"]), s1e, s1o,
      w2b, r2, r2t, r2d(p["bn2_g"]), r2d(p["bn2_b"]), s2e, s2o,
      wf1, r2d(p["bnf1_g"]), r2d(p["bnf1_b"]),
      p["fc2_w"].T, r2d(p["fc2_b"]),
      p["fc3_w"].T, r2d(p["fc3_b"]))

    log_pred = packed[:, 0:10]
    pred = packed[:, 10:20]
    logits = packed[:, 20:30]
    feas = packed[:, 30:114]
    return log_pred, pred, logits, feas


# -----------------------------------------------------------------------------
# Deterministic parameter init + run
# -----------------------------------------------------------------------------
def init_params(key):
    ks = jax.random.split(key, 20)
    n = lambda k, s, sc: sc * jax.random.normal(k, s, dtype=jnp.float32)
    u = lambda k, s: jax.random.uniform(k, s, jnp.float32, 0.5, 1.5)
    return {
        # conv/fc1 biases kept for module fidelity but cancel exactly under batch-stat
        # BatchNorm, so the kernel does not consume them.
        "conv1_w": n(ks[0], (6, 1, 5, 5), 0.2),  "conv1_b": n(ks[1], (6,), 0.1),
        "bn1_g":   u(ks[2], (6,)),               "bn1_b":   n(ks[3], (6,), 0.1),
        "conv2_w": n(ks[4], (16, 6, 5, 5), 0.1), "conv2_b": n(ks[5], (16,), 0.1),
        "bn2_g":   u(ks[6], (16,)),              "bn2_b":   n(ks[7], (16,), 0.1),
        "fc1_w":   n(ks[8], (120, 256), 0.05),   "fc1_b":   n(ks[9], (120,), 0.1),
        "bnf1_g":  u(ks[10], (120,)),            "bnf1_b":  n(ks[11], (120,), 0.1),
        "fc2_w":   n(ks[12], (84, 120), 0.05),   "fc2_b":   n(ks[13], (84,), 0.1),
        "fc3_w":   n(ks[14], (10, 84), 0.05),    "fc3_b":   n(ks[15], (10,), 0.1),
    }


if __name__ == "__main__":
    key = jax.random.PRNGKey(0)
    pkey, xkey = jax.random.split(key)
    params = init_params(pkey)
    # LeNet geometry requires 28x28 single-channel input (fc1 expects 16*4*4 features).
    x = jax.random.normal(xkey, (2, 1, 28, 28), dtype=jnp.float32)

    fwd = jax.jit(lenet_bn_forward)
    log_pred, pred, logits, feas = fwd(x, params)
    jax.block_until_ready((log_pred, pred, logits, feas))

    assert log_pred.shape == (2, 10) and pred.shape == (2, 10)
    assert logits.shape == (2, 10) and feas.shape == (2, 84)
    assert bool(jnp.all(jnp.isfinite(log_pred)))
    assert bool(jnp.allclose(jnp.sum(pred, axis=1), 1.0, atol=1e-4))
    print("KERNEL_OK")
</pallas_src>

<mosaic_0001>
module attributes {stable_mosaic.version = 11 : i64} {
  func.func @_lenet_kernel(%arg0: memref<56x28xf32, #tpu.memory_space<vmem>>, %arg1: memref<140x144xf32, #tpu.memory_space<vmem>>, %arg2: memref<144x6xf32, #tpu.memory_space<vmem>>, %arg3: memref<6x144xf32, #tpu.memory_space<vmem>>, %arg4: memref<1x6xf32, #tpu.memory_space<vmem>>, %arg5: memref<1x6xf32, #tpu.memory_space<vmem>>, %arg6: memref<144x72xf32, #tpu.memory_space<vmem>>, %arg7: memref<144x72xf32, #tpu.memory_space<vmem>>, %arg8: memref<360x128xf32, #tpu.memory_space<vmem>>, %arg9: memref<128x16xf32, #tpu.memory_space<vmem>>, %arg10: memref<16x128xf32, #tpu.memory_space<vmem>>, %arg11: memref<1x16xf32, #tpu.memory_space<vmem>>, %arg12: memref<1x16xf32, #tpu.memory_space<vmem>>, %arg13: memref<128x64xf32, #tpu.memory_space<vmem>>, %arg14: memref<128x64xf32, #tpu.memory_space<vmem>>, %arg15: memref<256x120xf32, #tpu.memory_space<vmem>>, %arg16: memref<1x120xf32, #tpu.memory_space<vmem>>, %arg17: memref<1x120xf32, #tpu.memory_space<vmem>>, %arg18: memref<120x84xf32, #tpu.memory_space<vmem>>, %arg19: memref<1x84xf32, #tpu.memory_space<vmem>>, %arg20: memref<84x10xf32, #tpu.memory_space<vmem>>, %arg21: memref<1x10xf32, #tpu.memory_space<vmem>>, %arg22: memref<2x128xf32, #tpu.memory_space<vmem>>, %arg23: memref<48x72xf32, #tpu.memory_space<vmem>>, %arg24: memref<24x72xf32, #tpu.memory_space<vmem>>, %arg25: memref<16x64xf32, #tpu.memory_space<vmem>>, %arg26: memref<8x64xf32, #tpu.memory_space<vmem>>) attributes {dimension_semantics = [], scalar_prefetch = 0 : i64, scratch_operands = 4 : i64, tpu.core_type = #tpu.core_type<tc>} {
    %c0 = arith.constant 0 : index
    %c0_0 = arith.constant 0 : index
    %0 = vector.load %arg0[%c0, %c0_0] : memref<56x28xf32, #tpu.memory_space<vmem>>, vector<24x28xf32>
    %c1 = arith.constant 1 : index
    %c0_1 = arith.constant 0 : index
    %1 = vector.load %arg0[%c1, %c0_1] : memref<56x28xf32, #tpu.memory_space<vmem>>, vector<24x28xf32>
    %c2 = arith.constant 2 : index
    %c0_2 = arith.constant 0 : index
    %2 = vector.load %arg0[%c2, %c0_2] : memref<56x28xf32, #tpu.memory_space<vmem>>, vector<24x28xf32>
    %c3 = arith.constant 3 : index
    %c0_3 = arith.constant 0 : index
    %3 = vector.load %arg0[%c3, %c0_3] : memref<56x28xf32, #tpu.memory_space<vmem>>, vector<24x28xf32>
    %c4 = arith.constant 4 : index
    %c0_4 = arith.constant 0 : index
    %4 = vector.load %arg0[%c4, %c0_4] : memref<56x28xf32, #tpu.memory_space<vmem>>, vector<24x28xf32>
    %5 = tpu.concatenate %0, %1, %2, %3, %4 in 1 : vector<24x28xf32>, vector<24x28xf32>, vector<24x28xf32>, vector<24x28xf32>, vector<24x28xf32> -> vector<24x140xf32>
    %c28 = arith.constant 28 : index
    %c0_5 = arith.constant 0 : index
    %6 = vector.load %arg0[%c28, %c0_5] : memref<56x28xf32, #tpu.memory_space<vmem>>, vector<24x28xf32>
    %c29 = arith.constant 29 : index
    %c0_6 = arith.constant 0 : index
    %7 = vector.load %arg0[%c29, %c0_6] : memref<56x28xf32, #tpu.memory_space<vmem>>, vector<24x28xf32>
    %c30 = arith.constant 30 : index
    %c0_7 = arith.constant 0 : index
    %8 = vector.load %arg0[%c30, %c0_7] : memref<56x28xf32, #tpu.memory_space<vmem>>, vector<24x28xf32>
    %c31 = arith.constant 31 : index
    %c0_8 = arith.constant 0 : index
    %9 = vector.load %arg0[%c31, %c0_8] : memref<56x28xf32, #tpu.memory_space<vmem>>, vector<24x28xf32>
    %c32 = arith.constant 32 : index
    %c0_9 = arith.constant 0 : index
    %10 = vector.load %arg0[%c32, %c0_9] : memref<56x28xf32, #tpu.memory_space<vmem>>, vector<24x28xf32>
    %11 = tpu.concatenate %6, %7, %8, %9, %10 in 1 : vector<24x28xf32>, vector<24x28xf32>, vector<24x28xf32>, vector<24x28xf32>, vector<24x28xf32> -> vector<24x140xf32>
    %12 = tpu.concatenate %5, %11 in 0 : vector<24x140xf32>, vector<24x140xf32> -> vector<48x140xf32>
    %c0_10 = arith.constant 0 : index
    %c0_11 = arith.constant 0 : index
    %13 = vector.load %arg1[%c0_10, %c0_11] : memref<140x144xf32, #tpu.memory_space<vmem>>, vector<140x144xf32>
    %cst = arith.constant dense<0.000000e+00> : vector<48x144xf32>
    %14 = tpu.matmul %12, %13, %cst {dimension_numbers = #tpu.dot_dimension_numbers<[1], [0], [0], [1], [0, 0, 1, 1], [], []>} : vector<48x140xf32>, vector<140x144xf32>, vector<48x144xf32> -> vector<48x144xf32>
    %cst_12 = arith.constant dense<0.000000e+00> : vector<144xf32>
    %15 = vector.multi_reduction <add>, %14, %cst_12 [0] : vector<48x144xf32> to vector<144xf32>
    %16 = vector.shape_cast %15 : vector<144xf32> to vector<1x144xf32>
    %c0_13 = arith.constant 0 : index
    %c0_14 = arith.constant 0 : index
    %17 = vector.load %arg2[%c0_13, %c0_14] : memref<144x6xf32, #tpu.memory_space<vmem>>, vector<144x6xf32>
    %cst_15 = arith.constant dense<0.000000e+00> : vector<1x6xf32>
    %18 = tpu.matmul %16, %17, %cst_15 {dimension_numbers = #tpu.dot_dimension_numbers<[1], [0], [0], [1], [0, 0, 1, 1], [], []>} : vector<1x144xf32>, vector<144x6xf32>, vector<1x6xf32> -> vector<1x6xf32>
    %cst_16 = arith.constant 1.152000e+03 : f32
    %19 = vector.broadcast %cst_16 : f32 to vector<1x6xf32>
    %20 = arith.divf %18, %19 : vector<1x6xf32>
    %21 = arith.mulf %14, %14 : vector<48x144xf32>
    %cst_17 = arith.constant dense<0.000000e+00> : vector<144xf32>
    %22 = vector.multi_reduction <add>, %21, %cst_17 [0] : vector<48x144xf32> to vector<144xf32>
    %23 = vector.shape_cast %22 : vector<144xf32> to vector<1x144xf32>
    %c0_18 = arith.constant 0 : index
    %c0_19 = arith.constant 0 : index
    %24 = vector.load %arg2[%c0_18, %c0_19] : memref<144x6xf32, #tpu.memory_space<vmem>>, vector<144x6xf32>
    %cst_20 = arith.constant dense<0.000000e+00> : vector<1x6xf32>
    %25 = tpu.matmul %23, %24, %cst_20 {dimension_numbers = #tpu.dot_dimension_numbers<[1], [0], [0], [1], [0, 0, 1, 1], [], []>} : vector<1x144xf32>, vector<144x6xf32>, vector<1x6xf32> -> vector<1x6xf32>
    %cst_21 = arith.constant 1.152000e+03 : f32
    %26 = vector.broadcast %cst_21 : f32 to vector<1x6xf32>
    %27 = arith.divf %25, %26 : vector<1x6xf32>
    %28 = arith.mulf %20, %20 : vector<1x6xf32>
    %29 = arith.subf %27, %28 : vector<1x6xf32>
    %cst_22 = arith.constant 9.99999974E-6 : f32
    %30 = vector.broadcast %cst_22 : f32 to vector<1x6xf32>
    %31 = arith.addf %29, %30 : vector<1x6xf32>
    %32 = math.rsqrt %31 : vector<1x6xf32>
    %c0_23 = arith.constant 0 : index
    %c0_24 = arith.constant 0 : index
    %33 = vector.load %arg4[%c0_23, %c0_24] : memref<1x6xf32, #tpu.memory_space<vmem>>, vector<1x6xf32>
    %34 = arith.mulf %32, %33 : vector<1x6xf32>
    %c0_25 = arith.constant 0 : index
    %c0_26 = arith.constant 0 : index
    %35 = vector.load %arg5[%c0_25, %c0_26] : memref<1x6xf32, #tpu.memory_space<vmem>>, vector<1x6xf32>
    %36 = arith.mulf %20, %34 : vector<1x6xf32>
    %37 = arith.subf %35, %36 : vector<1x6xf32>
    %c0_27 = arith.constant 0 : index
    %c0_28 = arith.constant 0 : index
    %38 = vector.load %arg3[%c0_27, %c0_28] : memref<6x144xf32, #tpu.memory_space<vmem>>, vector<6x144xf32>
    %cst_29 = arith.constant dense<0.000000e+00> : vector<1x144xf32>
    %39 = tpu.matmul %34, %38, %cst_29 {dimension_numbers = #tpu.dot_dimension_numbers<[1], [0], [0], [1], [0, 0, 1, 1], [], []>} : vector<1x6xf32>, vector<6x144xf32>, vector<1x144xf32> -> vector<1x144xf32>
    %40 = vector.broadcast %39 : vector<1x144xf32> to vector<48x144xf32>
    %41 = arith.mulf %14, %40 : vector<48x144xf32>
    %c0_30 = arith.constant 0 : index
    %c0_31 = arith.constant 0 : index
    %42 = vector.load %arg3[%c0_30, %c0_31] : memref<6x144xf32, #tpu.memory_space<vmem>>, vector<6x144xf32>
    %cst_32 = arith.constant dense<0.000000e+00> : vector<1x144xf32>
    %43 = tpu.matmul %37, %42, %cst_32 {dimension_numbers = #tpu.dot_dimension_numbers<[1], [0], [0], [1], [0, 0, 1, 1], [], []>} : vector<1x6xf32>, vector<6x144xf32>, vector<1x144xf32> -> vector<1x144xf32>
    %44 = vector.broadcast %43 : vector<1x144xf32> to vector<48x144xf32>
    %45 = arith.addf %41, %44 : vector<48x144xf32>
    %cst_33 = arith.constant 0.000000e+00 : f32
    %46 = vector.broadcast %cst_33 : f32 to vector<48x144xf32>
    %47 = arith.maximumf %45, %46 : vector<48x144xf32>
    %c0_34 = arith.constant 0 : index
    %c0_35 = arith.constant 0 : index
    %48 = vector.load %arg6[%c0_34, %c0_35] : memref<144x72xf32, #tpu.memory_space<vmem>>, vector<144x72xf32>
    %cst_36 = arith.constant dense<0.000000e+00> : vector<48x72xf32>
    %49 = tpu.matmul %47, %48, %cst_36 {dimension_numbers = #tpu.dot_dimension_numbers<[1], [0], [0], [1], [0, 0, 1, 1], [], []>} : vector<48x144xf32>, vector<144x72xf32>, vector<48x72xf32> -> vector<48x72xf32>
    %c0_37 = arith.constant 0 : index
    %c0_38 = arith.constant 0 : index
    %50 = vector.load %arg7[%c0_37, %c0_38] : memref<144x72xf32, #tpu.memory_space<vmem>>, vector<144x72xf32>
    %cst_39 = arith.constant dense<0.000000e+00> : vector<48x72xf32>
    %51 = tpu.matmul %47, %50, %cst_39 {dimension_numbers = #tpu.dot_dimension_numbers<[1], [0], [0], [1], [0, 0, 1, 1], [], []>} : vector<48x144xf32>, vector<144x72xf32>, vector<48x72xf32> -> vector<48x72xf32>
    %52 = arith.maximumf %49, %51 : vector<48x72xf32>
    %c0_40 = arith.constant 0 : index
    %c0_41 = arith.constant 0 : index
    %53 = vector.load %arg23[%c0_40, %c0_41] : memref<48x72xf32, #tpu.memory_space<vmem>>, vector<48x72xf32>
    tpu.vector_store %arg23[%c0_40, %c0_41], %52 {strides = array<i32>} : memref<48x72xf32, #tpu.memory_space<vmem>>, vector<48x72xf32>,
    %c0_42 = arith.constant 0 : index
    %c0_43 = arith.constant 0 : index
    %54 = tpu.strided_load %arg23[%c0_42, %c0_43] {strides = array<i32: 2, 1>} : memref<48x72xf32, #tpu.memory_space<vmem>>, vector<24x72xf32>
    %c1_44 = arith.constant 1 : index
    %c0_45 = arith.constant 0 : index
    %55 = tpu.strided_load %arg23[%c1_44, %c0_45] {strides = array<i32: 2, 1>} : memref<48x72xf32, #tpu.memory_space<vmem>>, vector<24x72xf32>
    %56 = arith.maximumf %54, %55 : vector<24x72xf32>
    %c0_46 = arith.constant 0 : index
    %c0_47 = arith.constant 0 : index
    %57 = vector.load %arg24[%c0_46, %c0_47] : memref<24x72xf32, #tpu.memory_space<vmem>>, vector<24x72xf32>
    tpu.vector_store %arg24[%c0_46, %c0_47], %56 {strides = array<i32>} : memref<24x72xf32, #tpu.memory_space<vmem>>, vector<24x72xf32>,
    %c0_48 = arith.constant 0 : index
    %c0_49 = arith.constant 0 : index
    %58 = vector.load %arg24[%c0_48, %c0_49] : memref<24x72xf32, #tpu.memory_space<vmem>>, vector<8x72xf32>
    %c1_50 = arith.constant 1 : index
    %c0_51 = arith.constant 0 : index
    %59 = vector.load %arg24[%c1_50, %c0_51] : memref<24x72xf32, #tpu.memory_space<vmem>>, vector<8x72xf32>
    %c2_52 = arith.constant 2 : index
    %c0_53 = arith.constant 0 : index
    %60 = vector.load %arg24[%c2_52, %c0_53] : memref<24x72xf32, #tpu.memory_space<vmem>>, vector<8x72xf32>
    %c3_54 = arith.constant 3 : index
    %c0_55 = arith.constant 0 : index
    %61 = vector.load %arg24[%c3_54, %c0_55] : memref<24x72xf32, #tpu.memory_space<vmem>>, vector<8x72xf32>
    %c4_56 = arith.constant 4 : index
    %c0_57 = arith.constant 0 : index
    %62 = vector.load %arg24[%c4_56, %c0_57] : memref<24x72xf32, #tpu.memory_space<vmem>>, vector<8x72xf32>
    %63 = tpu.concatenate %58, %59, %60, %61, %62 in 1 : vector<8x72xf32>, vector<8x72xf32>, vector<8x72xf32>, vector<8x72xf32>, vector<8x72xf32> -> vector<8x360xf32>
    %c12 = arith.constant 12 : index
    %c0_58 = arith.constant 0 : index
    %64 = vector.load %arg24[%c12, %c0_58] : memref<24x72xf32, #tpu.memory_space<vmem>>, vector<8x72xf32>
    %c13 = arith.constant 13 : index
    %c0_59 = arith.constant 0 : index
    %65 = vector.load %arg24[%c13, %c0_59] : memref<24x72xf32, #tpu.memory_space<vmem>>, vector<8x72xf32>
    %c14 = arith.constant 14 : index
    %c0_60 = arith.constant 0 : index
    %66 = vector.load %arg24[%c14, %c0_60] : memref<24x72xf32, #tpu.memory_space<vmem>>, vector<8x72xf32>
    %c15 = arith.constant 15 : index
    %c0_61 = arith.constant 0 : index
    %67 = vector.load %arg24[%c15, %c0_61] : memref<24x72xf32, #tpu.memory_space<vmem>>, vector<8x72xf32>
    %c16 = arith.constant 16 : index
    %c0_62 = arith.constant 0 : index
    %68 = vector.load %arg24[%c16, %c0_62] : memref<24x72xf32, #tpu.memory_space<vmem>>, vector<8x72xf32>
    %69 = tpu.concatenate %64, %65, %66, %67, %68 in 1 : vector<8x72xf32>, vector<8x72xf32>, vector<8x72xf32>, vector<8x72xf32>, vector<8x72xf32> -> vector<8x360xf32>
    %70 = tpu.concatenate %63, %69 in 0 : vector<8x360xf32>, vector<8x360xf32> -> vector<16x360xf32>
    %c0_63 = arith.constant 0 : index
    %c0_64 = arith.constant 0 : index
    %71 = vector.load %arg8[%c0_63, %c0_64] : memref<360x128xf32, #tpu.memory_space<vmem>>, vector<360x128xf32>
    %cst_65 = arith.constant dense<0.000000e+00> : vector<16x128xf32>
    %72 = tpu.matmul %70, %71, %cst_65 {dimension_numbers = #tpu.dot_dimension_numbers<[1], [0], [0], [1], [0, 0, 1, 1], [], []>} : vector<16x360xf32>, vector<360x128xf32>, vector<16x128xf32> -> vector<16x128xf32>
    %cst_66 = arith.constant dense<0.000000e+00> : vector<128xf32>
    %73 = vector.multi_reduction <add>, %72, %cst_66 [0] : vector<16x128xf32> to vector<128xf32>
    %74 = vector.shape_cast %73 : vector<128xf32> to vector<1x128xf32>
    %c0_67 = arith.constant 0 : index
    %c0_68 = arith.constant 0 : index
    %75 = vector.load %arg9[%c0_67, %c0_68] : memref<128x16xf32, #tpu.memory_space<vmem>>, vector<128x16xf32>
    %cst_69 = arith.constant dense<0.000000e+00> : vector<1x16xf32>
    %76 = tpu.matmul %74, %75, %cst_69 {dimension_numbers = #tpu.dot_dimension_numbers<[1], [0], [0], [1], [0, 0, 1, 1], [], []>} : vector<1x128xf32>, vector<128x16xf32>, vector<1x16xf32> -> vector<1x16xf32>
    %cst_70 = arith.constant 1.280000e+02 : f32
    %77 = vector.broadcast %cst_70 : f32 to vector<1x16xf32>
    %78 = arith.divf %76, %77 : vector<1x16xf32>
    %79 = arith.mulf %72, %72 : vector<16x128xf32>
    %cst_71 = arith.constant dense<0.000000e+00> : vector<128xf32>
    %80 = vector.multi_reduction <add>, %79, %cst_71 [0] : vector<16x128xf32> to vector<128xf32>
    %81 = vector.shape_cast %80 : vector<128xf32> to vector<1x128xf32>
    %c0_72 = arith.constant 0 : index
    %c0_73 = arith.constant 0 : index
    %82 = vector.load %arg9[%c0_72, %c0_73] : memref<128x16xf32, #tpu.memory_space<vmem>>, vector<128x16xf32>
    %cst_74 = arith.constant dense<0.000000e+00> : vector<1x16xf32>
    %83 = tpu.matmul %81, %82, %cst_74 {dimension_numbers = #tpu.dot_dimension_numbers<[1], [0], [0], [1], [0, 0, 1, 1], [], []>} : vector<1x128xf32>, vector<128x16xf32>, vector<1x16xf32> -> vector<1x16xf32>
    %cst_75 = arith.constant 1.280000e+02 : f32
    %84 = vector.broadcast %cst_75 : f32 to vector<1x16xf32>
    %85 = arith.divf %83, %84 : vector<1x16xf32>
    %86 = arith.mulf %78, %78 : vector<1x16xf32>
    %87 = arith.subf %85, %86 : vector<1x16xf32>
    %cst_76 = arith.constant 9.99999974E-6 : f32
    %88 = vector.broadcast %cst_76 : f32 to vector<1x16xf32>
    %89 = arith.addf %87, %88 : vector<1x16xf32>
    %90 = math.rsqrt %89 : vector<1x16xf32>
    %c0_77 = arith.constant 0 : index
    %c0_78 = arith.constant 0 : index
    %91 = vector.load %arg11[%c0_77, %c0_78] : memref<1x16xf32, #tpu.memory_space<vmem>>, vector<1x16xf32>
    %92 = arith.mulf %90, %91 : vector<1x16xf32>
    %c0_79 = arith.constant 0 : index
    %c0_80 = arith.constant 0 : index
    %93 = vector.load %arg12[%c0_79, %c0_80] : memref<1x16xf32, #tpu.memory_space<vmem>>, vector<1x16xf32>
    %94 = arith.mulf %78, %92 : vector<1x16xf32>
    %95 = arith.subf %93, %94 : vector<1x16xf32>
    %c0_81 = arith.constant 0 : index
    %c0_82 = arith.constant 0 : index
    %96 = vector.load %arg10[%c0_81, %c0_82] : memref<16x128xf32, #tpu.memory_space<vmem>>, vector<16x128xf32>
    %cst_83 = arith.constant dense<0.000000e+00> : vector<1x128xf32>
    %97 = tpu.matmul %92, %96, %cst_83 {dimension_numbers = #tpu.dot_dimension_numbers<[1], [0], [0], [1], [0, 0, 1, 1], [], []>} : vector<1x16xf32>, vector<16x128xf32>, vector<1x128xf32> -> vector<1x128xf32>
    %98 = vector.broadcast %97 : vector<1x128xf32> to vector<16x128xf32>
    %99 = arith.mulf %72, %98 : vector<16x128xf32>
    %c0_84 = arith.constant 0 : index
    %c0_85 = arith.constant 0 : index
    %100 = vector.load %arg10[%c0_84, %c0_85] : memref<16x128xf32, #tpu.memory_space<vmem>>, vector<16x128xf32>
    %cst_86 = arith.constant dense<0.000000e+00> : vector<1x128xf32>
    %101 = tpu.matmul %95, %100, %cst_86 {dimension_numbers = #tpu.dot_dimension_numbers<[1], [0], [0], [1], [0, 0, 1, 1], [], []>} : vector<1x16xf32>, vector<16x128xf32>, vector<1x128xf32> -> vector<1x128xf32>
    %102 = vector.broadcast %101 : vector<1x128xf32> to vector<16x128xf32>
    %103 = arith.addf %99, %102 : vector<16x128xf32>
    %cst_87 = arith.constant 0.000000e+00 : f32
    %104 = vector.broadcast %cst_87 : f32 to vector<16x128xf32>
    %105 = arith.maximumf %103, %104 : vector<16x128xf32>
    %c0_88 = arith.constant 0 : index
    %c0_89 = arith.constant 0 : index
    %106 = vector.load %arg13[%c0_88, %c0_89] : memref<128x64xf32, #tpu.memory_space<vmem>>, vector<128x64xf32>
    %cst_90 = arith.constant dense<0.000000e+00> : vector<16x64xf32>
    %107 = tpu.matmul %105, %106, %cst_90 {dimension_numbers = #tpu.dot_dimension_numbers<[1], [0], [0], [1], [0, 0, 1, 1], [], []>} : vector<16x128xf32>, vector<128x64xf32>, vector<16x64xf32> -> vector<16x64xf32>
    %c0_91 = arith.constant 0 : index
    %c0_92 = arith.constant 0 : index
    %108 = vector.load %arg14[%c0_91, %c0_92] : memref<128x64xf32, #tpu.memory_space<vmem>>, vector<128x64xf32>
    %cst_93 = arith.constant dense<0.000000e+00> : vector<16x64xf32>
    %109 = tpu.matmul %105, %108, %cst_93 {dimension_numbers = #tpu.dot_dimension_numbers<[1], [0], [0], [1], [0, 0, 1, 1], [], []>} : vector<16x128xf32>, vector<128x64xf32>, vector<16x64xf32> -> vector<16x64xf32>
    %110 = arith.maximumf %107, %109 : vector<16x64xf32>
    %c0_94 = arith.constant 0 : index
    %c0_95 = arith.constant 0 : index
    %111 = vector.load %arg25[%c0_94, %c0_95] : memref<16x64xf32, #tpu.memory_space<vmem>>, vector<16x64xf32>
    tpu.vector_store %arg25[%c0_94, %c0_95], %110 {strides = array<i32>} : memref<16x64xf32, #tpu.memory_space<vmem>>, vector<16x64xf32>,
    %c0_96 = arith.constant 0 : index
    %c0_97 = arith.constant 0 : index
    %112 = tpu.strided_load %arg25[%c0_96, %c0_97] {strides = array<i32: 2, 1>} : memref<16x64xf32, #tpu.memory_space<vmem>>, vector<8x64xf32>
    %c1_98 = arith.constant 1 : index
    %c0_99 = arith.constant 0 : index
    %113 = tpu.strided_load %arg25[%c1_98, %c0_99] {strides = array<i32: 2, 1>} : memref<16x64xf32, #tpu.memory_space<vmem>>, vector<8x64xf32>
    %114 = arith.maximumf %112, %113 : vector<8x64xf32>
    %c0_100 = arith.constant 0 : index
    %c0_101 = arith.constant 0 : index
    %115 = vector.load %arg26[%c0_100, %c0_101] : memref<8x64xf32, #tpu.memory_space<vmem>>, vector<8x64xf32>
    tpu.vector_store %arg26[%c0_100, %c0_101], %114 {strides = array<i32>} : memref<8x64xf32, #tpu.memory_space<vmem>>, vector<8x64xf32>,
    %c0_102 = arith.constant 0 : index
    %c0_103 = arith.constant 0 : index
    %116 = tpu.strided_load %arg26[%c0_102, %c0_103] {strides = array<i32: 4, 1>} : memref<8x64xf32, #tpu.memory_space<vmem>>, vector<2x64xf32>
    %c1_104 = arith.constant 1 : index
    %c0_105 = arith.constant 0 : index
    %117 = tpu.strided_load %arg26[%c1_104, %c0_105] {strides = array<i32: 4, 1>} : memref<8x64xf32, #tpu.memory_space<vmem>>, vector<2x64xf32>
    %c2_106 = arith.constant 2 : index
    %c0_107 = arith.constant 0 : index
    %118 = tpu.strided_load %arg26[%c2_106, %c0_107] {strides = array<i32: 4, 1>} : memref<8x64xf32, #tpu.memory_space<vmem>>, vector<2x64xf32>
    %c3_108 = arith.constant 3 : index
    %c0_109 = arith.constant 0 : index
    %119 = tpu.strided_load %arg26[%c3_108, %c0_109] {strides = array<i32: 4, 1>} : memref<8x64xf32, #tpu.memory_space<vmem>>, vector<2x64xf32>
    %120 = tpu.concatenate %116, %117, %118, %119 in 1 : vector<2x64xf32>, vector<2x64xf32>, vector<2x64xf32>, vector<2x64xf32> -> vector<2x256xf32>
    %c0_110 = arith.constant 0 : index
    %c0_111 = arith.constant 0 : index
    %121 = vector.load %arg15[%c0_110, %c0_111] : memref<256x120xf32, #tpu.memory_space<vmem>>, vector<256x120xf32>
    %cst_112 = arith.constant dense<0.000000e+00> : vector<2x120xf32>
    %122 = tpu.matmul %120, %121, %cst_112 {dimension_numbers = #tpu.dot_dimension_numbers<[1], [0], [0], [1], [0, 0, 1, 1], [], []>} : vector<2x256xf32>, vector<256x120xf32>, vector<2x120xf32> -> vector<2x120xf32>
    %cst_113 = arith.constant dense<0.000000e+00> : vector<120xf32>
    %123 = vector.multi_reduction <add>, %122, %cst_113 [0] : vector<2x120xf32> to vector<120xf32>
    %124 = vector.shape_cast %123 : vector<120xf32> to vector<1x120xf32>
    %cst_114 = arith.constant 2.000000e+00 : f32
    %125 = vector.broadcast %cst_114 : f32 to vector<1x120xf32>
    %126 = arith.divf %124, %125 : vector<1x120xf32>
    %127 = arith.mulf %122, %122 : vector<2x120xf32>
    %cst_115 = arith.constant dense<0.000000e+00> : vector<120xf32>
    %128 = vector.multi_reduction <add>, %127, %cst_115 [0] : vector<2x120xf32> to vector<120xf32>
    %129 = vector.shape_cast %128 : vector<120xf32> to vector<1x120xf32>
    %cst_116 = arith.constant 2.000000e+00 : f32
    %130 = vector.broadcast %cst_116 : f32 to vector<1x120xf32>
    %131 = arith.divf %129, %130 : vector<1x120xf32>
    %132 = arith.mulf %126, %126 : vector<1x120xf32>
    %133 = arith.subf %131, %132 : vector<1x120xf32>
    %134 = vector.broadcast %126 : vector<1x120xf32> to vector<2x120xf32>
    %135 = arith.subf %122, %134 : vector<2x120xf32>
    %cst_117 = arith.constant 9.99999974E-6 : f32
    %136 = vector.broadcast %cst_117 : f32 to vector<1x120xf32>
    %137 = arith.addf %133, %136 : vector<1x120xf32>
    %138 = math.rsqrt %137 : vector<1x120xf32>
    %139 = vector.broadcast %138 : vector<1x120xf32> to vector<2x120xf32>
    %140 = arith.mulf %135, %139 : vector<2x120xf32>
    %c0_118 = arith.constant 0 : index
    %c0_119 = arith.constant 0 : index
    %141 = vector.load %arg16[%c0_118, %c0_119] : memref<1x120xf32, #tpu.memory_space<vmem>>, vector<1x120xf32>
    %142 = vector.broadcast %141 : vector<1x120xf32> to vector<2x120xf32>
    %143 = arith.mulf %140, %142 : vector<2x120xf32>
    %c0_120 = arith.constant 0 : index
    %c0_121 = arith.constant 0 : index
    %144 = vector.load %arg17[%c0_120, %c0_121] : memref<1x120xf32, #tpu.memory_space<vmem>>, vector<1x120xf32>
    %145 = vector.broadcast %144 : vector<1x120xf32> to vector<2x120xf32>
    %146 = arith.addf %143, %145 : vector<2x120xf32>
    %cst_122 = arith.constant 0.000000e+00 : f32
    %147 = vector.broadcast %cst_122 : f32 to vector<2x120xf32>
    %148 = arith.maximumf %146, %147 : vector<2x120xf32>
    %c0_123 = arith.constant 0 : index
    %c0_124 = arith.constant 0 : index
    %149 = vector.load %arg18[%c0_123, %c0_124] : memref<120x84xf32, #tpu.memory_space<vmem>>, vector<120x84xf32>
    %cst_125 = arith.constant dense<0.000000e+00> : vector<2x84xf32>
    %150 = tpu.matmul %148, %149, %cst_125 {dimension_numbers = #tpu.dot_dimension_numbers<[1], [0], [0], [1], [0, 0, 1, 1], [], []>} : vector<2x120xf32>, vector<120x84xf32>, vector<2x84xf32> -> vector<2x84xf32>
    %c0_126 = arith.constant 0 : index
    %c0_127 = arith.constant 0 : index
    %151 = vector.load %arg19[%c0_126, %c0_127] : memref<1x84xf32, #tpu.memory_space<vmem>>, vector<1x84xf32>
    %152 = vector.broadcast %151 : vector<1x84xf32> to vector<2x84xf32>
    %153 = arith.addf %150, %152 : vector<2x84xf32>
    %cst_128 = arith.constant 0.000000e+00 : f32
    %154 = vector.broadcast %cst_128 : f32 to vector<2x84xf32>
    %155 = arith.maximumf %153, %154 : vector<2x84xf32>
    %c0_129 = arith.constant 0 : index
    %c0_130 = arith.constant 0 : index
    %156 = vector.load %arg20[%c0_129, %c0_130] : memref<84x10xf32, #tpu.memory_space<vmem>>, vector<84x10xf32>
    %cst_131 = arith.constant dense<0.000000e+00> : vector<2x10xf32>
    %157 = tpu.matmul %155, %156, %cst_131 {dimension_numbers = #tpu.dot_dimension_numbers<[1], [0], [0], [1], [0, 0, 1, 1], [], []>} : vector<2x84xf32>, vector<84x10xf32>, vector<2x10xf32> -> vector<2x10xf32>
    %c0_132 = arith.constant 0 : index
    %c0_133 = arith.constant 0 : index
    %158 = vector.load %arg21[%c0_132, %c0_133] : memref<1x10xf32, #tpu.memory_space<vmem>>, vector<1x10xf32>
    %159 = vector.broadcast %158 : vector<1x10xf32> to vector<2x10xf32>
    %160 = arith.addf %157, %159 : vector<2x10xf32>
    %cst_134 = arith.constant dense<0xFF800000> : vector<2xf32>
    %161 = vector.multi_reduction <maximumf>, %160, %cst_134 [1] : vector<2x10xf32> to vector<2xf32>
    %162 = vector.shape_cast %161 : vector<2xf32> to vector<2x1xf32>
    %163 = vector.broadcast %162 : vector<2x1xf32> to vector<2x10xf32>
    %164 = arith.subf %160, %163 : vector<2x10xf32>
    %165 = math.exp %164 : vector<2x10xf32>
    %cst_135 = arith.constant dense<0.000000e+00> : vector<2xf32>
    %166 = vector.multi_reduction <add>, %165, %cst_135 [1] : vector<2x10xf32> to vector<2xf32>
    %167 = vector.shape_cast %166 : vector<2xf32> to vector<2x1xf32>
    %168 = vector.broadcast %167 : vector<2x1xf32> to vector<2x10xf32>
    %169 = arith.divf %165, %168 : vector<2x10xf32>
    %170 = math.log %167 : vector<2x1xf32>
    %171 = vector.broadcast %170 : vector<2x1xf32> to vector<2x10xf32>
    %172 = arith.subf %164, %171 : vector<2x10xf32>
    %cst_136 = arith.constant 0.000000e+00 : f32
    %173 = vector.broadcast %cst_136 : f32 to vector<2x14xf32>
    %174 = tpu.concatenate %172, %169, %160, %155, %173 in 1 : vector<2x10xf32>, vector<2x10xf32>, vector<2x10xf32>, vector<2x84xf32>, vector<2x14xf32> -> vector<2x128xf32>
    %c0_137 = arith.constant 0 : index
    %c0_138 = arith.constant 0 : index
    %175 = vector.load %arg22[%c0_137, %c0_138] : memref<2x128xf32, #tpu.memory_space<vmem>>, vector<2x128xf32>
    tpu.vector_store %arg22[%c0_137, %c0_138], %174 {strides = array<i32>} : memref<2x128xf32, #tpu.memory_space<vmem>>, vector<2x128xf32>,
    return
  }
}

</mosaic_0001>

<bundles_post_ra>
// kernel: lenet_bn_forward.1
= control target key start
LH: loop header
LB: loop body
LE: loop exit
PB: predicated region body
PF: predicated region fallthrough
CT: control target
= control target key end

     0   :  { %s3019_s24 = smov 84   ;;  %s3017_s30 = smov 112   ;;  %vm274_vm0 = vcmask 1043456   ;;  %vm261_vm1 = vcmask 97280   ;;  %vm134_vm2 = vcmask 228352   ;;  %vm138_vm3 = vcmask 457728   ;;  %s2988_s0 = inlined_call_operand.vmem [shape: f32[56,28], index: 0, kind: input, shape index: {}]   ;;  %s2989_s1 = inlined_call_operand.vmem [shape: f32[140,144], index: 1, kind: input, shape index: {}]   ;;  %s2990_s2 = inlined_call_operand.vmem [shape: f32[144,6], index: 2, kind: input, shape index: {}]   ;;  %s2991_s3 = inlined_call_operand.vmem [shape: f32[6,144], index: 3, kind: input, shape index: {}]   ;;  %s2992_s6 = inlined_call_operand.vmem [shape: f32[144,72], index: 6, kind: input, shape index: {}]   ;;  %s2993_s4 = inlined_call_operand.vmem [shape: f32[1,6], index: 4, kind: input, shape index: {}]   ;;  %s2994_s7 = inlined_call_operand.vmem [shape: f32[144,72], index: 7, kind: input, shape index: {}]   ;;  %s2995_s5 = inlined_call_operand.vmem [shape: f32[1,6], index: 5, kind: input, shape index: {}]   ;;  %s2996_s8 = inlined_call_operand.vmem [shape: f32[360,128], index: 8, kind: input, shape index: {}]   ;;  %s2997_s9 = inlined_call_operand.vmem [shape: f32[128,16], index: 9, kind: input, shape index: {}]   ;;  %s2998_s10 = inlined_call_operand.vmem [shape: f32[16,128], index: 10, kind: input, shape index: {}]   ;;  %s2999_s13 = inlined_call_operand.vmem [shape: f32[128,64], index: 13, kind: input, shape index: {}]   ;;  %s3000_s14 = inlined_call_operand.vmem [shape: f32[128,64], index: 14, kind: input, shape index: {}]   ;;  %s3001_s11 = inlined_call_operand.vmem [shape: f32[1,16], index: 11, kind: input, shape index: {}]   ;;  %s3002_s12 = inlined_call_operand.vmem [shape: f32[1,16], index: 12, kind: input, shape index: {}]   ;;  %s3003_s15 = inlined_call_operand.vmem [shape: f32[256,120], index: 15, kind: input, shape index: {}]   ;;  %s3004_s16 = inlined_call_operand.vmem [shape: f32[1,120], index: 16, kind: input, shape index: {}]   ;;  %s3005_s17 = inlined_call_operand.vmem [shape: f32[1,120], index: 17, kind: input, shape index: {}]   ;;  %s3006_s19 = inlined_call_operand.vmem [shape: f32[1,84], index: 19, kind: input, shape index: {}]   ;;  %s3007_s18 = inlined_call_operand.vmem [shape: f32[120,84], index: 18, kind: input, shape index: {}]   ;;  %s3008_s20 = inlined_call_operand.vmem [shape: f32[84,10], index: 20, kind: input, shape index: {}]   ;;  %s3009_s21 = inlined_call_operand.vmem [shape: f32[1,10], index: 21, kind: input, shape index: {}]   ;;  %s3010_s22 = inlined_call_operand.vmem [shape: f32[2,128], index: 22, kind: output, shape index: {}]  }
   0x1   :  { %3021 = sst [smem:[#allocation6_spill]] %s2988_s0  ;;  %s1797_s26 = smov 56   ;;  %vm142_vm4 = vcmask 687104   ;;  %vm146_vm5 = vcmask 916480   ;;  %vm432_vm6 = vcmask 130048   ;;  %vm627_vm7 = vcmask 1045504  }
   0x2   :  { %3022 = sst [smem:[#allocation7_spill]] %s2989_s1  ;;  %vm623_vm12 = vcmask 48128   ;;  %vm957_vm13 = vcmask 588800   ;;  %vm1004_vm14 = vcmask 719872   ;;  %vm1006_vm15 = vcmask 261120   ;;  %s1804_s25 = smov 64  }
   0x3   :  { %3023 = sst [smem:[#allocation8_spill]] %s2990_s2  ;;  %s3031_s2 = smov 84  }
   0x4   :  { %3024 = sst [smem:[#allocation9_spill]] %s2991_s3 }
   0x5   :  { %3025 = sst [smem:[#allocation10_spill]] %s2992_s6  ;;  %s3030_s6 = smov 112  }
   0x6   :  { %3026 = sst [smem:[#allocation11_spill]] %s2993_s4 }
   0x7   :  { %3027 = sst [smem:[#allocation12_spill]] %s2994_s7  ;;  %s1795_s7 = smov 28  }
   0x8   :  { %s3028_s29 = sld [smem:[#allocation6_spill]] }
   0x9   :  { %s3033_s1 = sld [smem:[#allocation9_spill]] }
   0xa   :  { %s3035_s28 = sld [smem:[#allocation11_spill]] }
   0xe   :  { %v80_v0 = vld [vmem:[%s3028_s29 + $0x3] sm:$0xff]  ;;  %v81_v1 = vld [vmem:[%s3028_s29 + $0xb] sm:$0xff]  ;;  %v82_v15 = vld [vmem:[%s3028_s29 + $0x13] sm:$0xff] }
   0xf   :  { %v74_v2 = vld [vmem:[%s3028_s29 + $0x1] sm:$0xff]  ;;  %v1742_v3 = vpack.i.bf16 %v81_v1, %v80_v0  ;;  %v75_v4 = vld [vmem:[%s3028_s29 + $0x9] sm:$0xff]  ;;  %v76_v9 = vld [vmem:[%s3028_s29 + $0x11] sm:$0xff] }
  0x10   :  { %v1732_v5 = vpack.i.bf16 %v75_v4, %v74_v2  ;;  %v84_v6 = vld [vmem:[%s3028_s29 + $0xc] sm:$0xff]  ;;  %v77_v7 = vld [vmem:[%s3028_s29 + $0x2] sm:$0xff]  ;;  %v85_v27 = vld [vmem:[%s3028_s29 + $0x14] sm:$0xff] }
  0x11   :  { %1743 = vrot.lane.b32.xlu1 %v1742_v3, %s3019_s24  ;;  %v78_v8 = vld [vmem:[%s3028_s29 + $0xa] sm:$0xff]  ;;  %127 = vrot.lane.b32.xlu2 %v84_v6, %s3017_s30  ;;  %v153_v10 = vld [vmem:[%s3028_s29 + $0x1d] sm:$0xff] }
  0x12   :  { %1733 = vrot.lane.b32.xlu0 %v1732_v5, %s1795_s7  ;;  %v83_v11 = vld [vmem:[%s3028_s29 + $0x4] sm:$0xff]  ;;  %v1737_v12 = vpack.i.bf16 %v78_v8, %v77_v7  ;;  %v1747_v13 = vpack.i.bf16 %v153_v10, %v76_v9  ;;  %v79_v14 = vld [vmem:[%s3028_s29 + $0x12] sm:$0xff] }
  0x13   :  { %v159_v16 = vld [vmem:[%s3028_s29 + $0x1f] sm:$0xff]  ;;  %v155_v31 = vld [vmem:[%s3028_s29 + $0x2d] sm:$0xff] }
  0x14   :  { %v156_v17 = vld [vmem:[%s3028_s29 + $0x1e] sm:$0xff]  ;;  %v1757_v22 = vpack.i.bf16 %v159_v16, %v82_v15  ;;  %v157_v40 = vld [vmem:[%s3028_s29 + $0x26] sm:$0xff]  ;;  %v158_v46 = vld [vmem:[%s3028_s29 + $0x2e] sm:$0xff] }
  0x15   :  { %v1752_v25 = vpack.i.bf16 %v156_v17, %v79_v14  ;;  %v154_v30 = vld [vmem:[%s3028_s29 + $0x25] sm:$0xff]  ;;  %v164_v47 = vld [vmem:[%s3028_s29 + $0x30] sm:$0xff] }
  0x16   :  { %v1762_v35 = vpack.i.bf16 %v155_v31, %v154_v30  ;;  %v162_v38 = vld [vmem:[%s3028_s29 + $0x20] sm:$0xff]  ;;  %v163_v44 = vld [vmem:[%s3028_s29 + $0x28] sm:$0xff] }
  0x17   :  { %v160_v45 = vld [vmem:[%s3028_s29 + $0x27] sm:$0xff]  ;;  %v161_v48 = vld [vmem:[%s3028_s29 + $0x2f] sm:$0xff] }
  0x18   :  { %v71_v7 = vld [vmem:[%s3028_s29] sm:$0xff]  ;;  %v72_v14 = vld [vmem:[%s3028_s29 + $0x8] sm:$0xff] }
  0x19   :  { %125 = vrot.lane.b32.xlu1 %v83_v11, %s3017_s30  ;;  %1748 = vrot.lane.b32.xlu2 %v1747_v13, %s1795_s7  ;;  %s3029_s30 = sld [smem:[#allocation7_spill]] }
  0x1a   :  { %1738 = vrot.lane.b32.xlu0 %v1737_v12, %s1797_s26 }
  0x1f   :  { %v255_v18 = vld [vmem:[%s3029_s30 + $0xf0] sm:$0xff]  ;;  %v256_v19 = vld [vmem:[%s3029_s30 + $0xf8] sm:$0xff]  ;;  %v253_v20 = vld [vmem:[%s3029_s30 + $0xe0] sm:$0xff] }
  0x20   :  { %281 = vmatpush.msra.mxu0 %v255_v18  ;;  %351 = vmatpush.msra.mxu2 %v256_v19  ;;  %v254_v21 = vld [vmem:[%s3029_s30 + $0xe8] sm:$0xff]  ;;  %v251_v23 = vld [vmem:[%s3029_s30 + $0xd0] sm:$0xff]  ;;  %v252_v24 = vld [vmem:[%s3029_s30 + $0xd8] sm:$0xff] }
  0x21   :  { %v249_v26 = vld [vmem:[%s3029_s30 + $0xc0] sm:$0xff]  ;;  %v250_v28 = vld [vmem:[%s3029_s30 + $0xc8] sm:$0xff]  ;;  %1758 = vrot.lane.b32.xlu1 %v1757_v22, %s3019_s24  ;;  %v247_v29 = vld [vmem:[%s3029_s30 + $0xb0] sm:$0xff] }
  0x22   :  { %282 = vmatpush.msra.mxu0 %v253_v20  ;;  %352 = vmatpush.msra.mxu2 %v254_v21  ;;  %v248_v32 = vld [vmem:[%s3029_s30 + $0xb8] sm:$0xff]  ;;  %v245_v33 = vld [vmem:[%s3029_s30 + $0xa0] sm:$0xff]  ;;  %v246_v34 = vld [vmem:[%s3029_s30 + $0xa8] sm:$0xff] }
  0x23   :  { %1753 = vrot.lane.b32.xlu0 %v1752_v25, %s1797_s26  ;;  %129 = vrot.lane.b32.xlu2 %v85_v27, %s3030_s6  ;;  %v243_v36 = vld [vmem:[%s3029_s30 + $0x90] sm:$0xff]  ;;  %v244_v37 = vld [vmem:[%s3029_s30 + $0x98] sm:$0xff] }
  0x24   :  { %283 = vmatpush.msra.mxu0 %v251_v23  ;;  %353 = vmatpush.msra.mxu2 %v252_v24  ;;  %v241_v39 = vld [vmem:[%s3029_s30 + $0x80] sm:$0xff]  ;;  %v242_v41 = vld [vmem:[%s3029_s30 + $0x88] sm:$0xff]  ;;  %v239_v42 = vld [vmem:[%s3029_s30 + $0x70] sm:$0xff] }
  0x25   :  { %v240_v43 = vld [vmem:[%s3029_s30 + $0x78] sm:$0xff]  ;;  %v237_v49 = vld [vmem:[%s3029_s30 + $0x60] sm:$0xff]  ;;  %v238_v50 = vld [vmem:[%s3029_s30 + $0x68] sm:$0xff] }
  0x26   :  { %284 = vmatpush.msra.mxu0 %v249_v26  ;;  %354 = vmatpush.msra.mxu2 %v250_v28  ;;  %v235_v51 = vld [vmem:[%s3029_s30 + $0x50] sm:$0xff]  ;;  %v236_v52 = vld [vmem:[%s3029_s30 + $0x58] sm:$0xff]  ;;  %v233_v53 = vld [vmem:[%s3029_s30 + $0x40] sm:$0xff] }
  0x27   :  { %v234_v54 = vld [vmem:[%s3029_s30 + $0x48] sm:$0xff]  ;;  %v259_v55 = vld [vmem:[%s3029_s30 + $0x110] sm:$0xf]  ;;  %v260_v56 = vld [vmem:[%s3029_s30 + $0x118] sm:$0xf] }
  0x28   :  { %285 = vmatpush.msra.mxu0 %v247_v29  ;;  %355 = vmatpush.msra.mxu2 %v248_v32  ;;  %v231_v57 = vld [vmem:[%s3029_s30 + $0x30] sm:$0xff]  ;;  %v232_v58 = vld [vmem:[%s3029_s30 + $0x38] sm:$0xff]  ;;  %v257_v59 = vld [vmem:[%s3029_s30 + $0x100] sm:$0xff] }
  0x29   :  { %1763 = vrot.lane.b32.xlu1 %v1762_v35, %s1795_s7  ;;  %1674 = vmatpush.msk.msra.mxu1 %vm274_vm0, %v259_v55  ;;  %v258_v60 = vld [vmem:[%s3029_s30 + $0x108] sm:$0xff]  ;;  %v229_v61 = vld [vmem:[%s3029_s30 + $0x20] sm:$0xff]  ;;  %v227_v63 = vld [vmem:[%s3029_s30 + $0x10] sm:$0xff] }
  0x2a   :  { %286 = vmatpush.msra.mxu0 %v245_v33  ;;  %356 = vmatpush.msra.mxu2 %v246_v34  ;;  %v230_v62 = vld [vmem:[%s3029_s30 + $0x28] sm:$0xff]  ;;  %v228_v0 = vld [vmem:[%s3029_s30 + $0x18] sm:$0xff]  ;;  %v225_v1 = vld [vmem:[%s3029_s30] sm:$0xff] }
  0x2b   :  { %204 = vrot.lane.b32.xlu0 %v162_v38, %s3030_s6  ;;  %182 = vrot.lane.b32.xlu2 %v157_v40, %s1797_s26  ;;  %v226_v2 = vld [vmem:[%s3029_s30 + $0x8] sm:$0xff]  ;;  %v73_v24 = vld [vmem:[%s3028_s29 + $0x10] sm:$0xff]  ;;  %s1802_s30 = smov 72  }
  0x2c   :  { %287 = vmatpush.msra.mxu0 %v243_v36  ;;  %357 = vmatpush.msra.mxu2 %v244_v37  ;;  %v150_v35 = vld [vmem:[%s3028_s29 + $0x1c] sm:$0xff] }
  0x2d   :  { %1681 = vmatpush.msk.msra.mxu3 %vm274_vm0, %v260_v56  ;;  %331 = vmatpush.msra.mxu1 %v257_v59 }
  0x2e   :  { %288 = vmatpush.msra.mxu0 %v241_v39  ;;  %358 = vmatpush.msra.mxu2 %v242_v41 }
  0x2f   :  { %401 = vmatpush.msra.mxu3 %v258_v60 }
  0x30   :  { %289 = vmatpush.msra.mxu0 %v239_v42  ;;  %359 = vmatpush.msra.mxu2 %v240_v43 }
  0x31   :  { %206 = vrot.lane.b32.xlu1 %v163_v44, %s3030_s6 }
  0x32   :  { %290 = vmatpush.msra.mxu0 %v237_v49  ;;  %360 = vmatpush.msra.mxu2 %v238_v50 }
  0x33   :  { %194 = vrot.lane.b32.xlu0 %v160_v45, %s3031_s2  ;;  %184 = vrot.lane.b32.xlu2 %v158_v46, %s1797_s26  ;;  %v151_v45 = vld [vmem:[%s3028_s29 + $0x24] sm:$0xff] }
  0x34   :  { %291 = vmatpush.msra.mxu0 %v235_v51  ;;  %361 = vmatpush.msra.mxu2 %v236_v52 }
  0x36   :  { %292 = vmatpush.msra.mxu0 %v233_v53  ;;  %362 = vmatpush.msra.mxu2 %v234_v54  ;;  %v152_v54 = vld [vmem:[%s3028_s29 + $0x2c] sm:$0xff]  ;;  %s3034_s29 = sld [smem:[#allocation10_spill]] }
  0x38   :  { %293 = vmatpush.msra.mxu0 %v231_v57  ;;  %363 = vmatpush.msra.mxu2 %v232_v58 }
  0x39   :  { %208 = vrot.lane.b32.xlu1 %v164_v47, %s3030_s6  ;;  %s1801_s6 = smov 32  }
  0x3a   :  { %294 = vmatpush.msra.mxu0 %v229_v61  ;;  %364 = vmatpush.msra.mxu2 %v230_v62 }
  0x3b   :  { %196 = vrot.lane.b32.xlu0 %v161_v48, %s3031_s2  ;;  %s3032_s2 = sld [smem:[#allocation8_spill]] }
  0x3c   :  { %295 = vmatpush.msra.mxu0 %v227_v63  ;;  %365 = vmatpush.msra.mxu2 %v228_v0 }
  0x3e   :  { %296 = vmatpush.msra.mxu0 %v225_v1  ;;  %366 = vmatpush.msra.mxu2 %v226_v2 }
  0x41   :  { %v465_v0 = vld [vmem:[%s3032_s2 + $0x78] sm:$0xff]  ;;  %v2183_v1 = vld [vmem:[%s3032_s2 + $0x88] sm:$0xff]  ;;  %v464_v2 = vld [vmem:[%s3032_s2 + $0x70] sm:$0xff] }
  0x42   :  { %471 = vmatpush.msrb.mxu1 %v465_v0  ;;  %505 = vmatpush.msrb.mxu3 %v2183_v1 }
  0x43   :  { %562 = vmatpush.msrb.mxu0 %v465_v0 }
  0x44   :  { %472 = vmatpush.msrb.mxu1 %v464_v2 }
  0x45   :  { %563 = vmatpush.msrb.mxu0 %v464_v2 }
  0x6b   :  { %v128_v5 = vpop.permute.xlu2 %127 }
  0x73   :  { %v1749_v19 = vpop.permute.xlu2 %1748 }
  0x74   :  { %v1750_v23 = vunpack.i.l.bf16 %v1749_v19  ;;  %v1751_v34 = vunpack.i.h.bf16 %v1749_v19  ;;  %v455_v19 = vld [vmem:[%s3032_s2 + $0x28] sm:$0xff] }
  0x76   :  { %v137_v29 = vsel %vm134_vm2, %v73_v24, %v1750_v23  ;;  %v213_v40 = vsel %vm134_vm2, %v150_v35, %v1751_v34 }
  0x7d   :  { %v130_v32 = vpop.permute.xlu2 %129 }
  0x83   :  { %v1744_v3 = vpop.permute.xlu1 %1743 }
  0x84   :  { %v1734_v4 = vpop.permute.xlu0 %1733  ;;  %v1745_v11 = vunpack.i.l.bf16 %v1744_v3  ;;  %v1746_v22 = vunpack.i.h.bf16 %v1744_v3 }
  0x85   :  { %v1735_v6 = vunpack.i.l.bf16 %v1734_v4  ;;  %v1736_v12 = vunpack.i.h.bf16 %v1734_v4  ;;  %v183_v46 = vpop.permute.xlu2 %182  ;;  %v463_v4 = vld [vmem:[%s3032_s2 + $0x68] sm:$0xff] }
  0x86   :  { %473 = vmatpush.msrb.mxu1 %v463_v4  ;;  %564 = vmatpush.msrb.mxu0 %v463_v4 }
  0x87   :  { %v135_v13 = vsel %vm134_vm2, %v71_v7, %v1735_v6  ;;  %v136_v20 = vsel %vm134_vm2, %v72_v14, %v1736_v12  ;;  %v461_v6 = vld [vmem:[%s3032_s2 + $0x58] sm:$0xff]  ;;  %v458_v12 = vld [vmem:[%s3032_s2 + $0x40] sm:$0xff] }
  0x8b   :  { %v126_v8 = vpop.permute.xlu1 %125 }
  0x8c   :  { %v1739_v9 = vpop.permute.xlu0 %1738  ;;  %1675 = vmatmul.msk.f32.vlgmr.msra.gmra.mxu1 %vm261_vm1, %v126_v8  ;;  %1682 = vmatmul.msk.f32.vlgmr.msra.gmra.mxu3 %vm261_vm1, %v126_v8 }
  0x8d   :  { %v1740_v10 = vunpack.i.l.bf16 %v1739_v9  ;;  %v1741_v15 = vunpack.i.h.bf16 %v1739_v9  ;;  %v185_v57 = vpop.permute.xlu2 %184 }
  0x8f   :  { %v139_v16 = vsel %vm138_vm3, %v135_v13, %v1740_v10  ;;  %v140_v21 = vsel %vm138_vm3, %v136_v20, %v1741_v15  ;;  %v460_v10 = vld [vmem:[%s3032_s2 + $0x50] sm:$0xff] }
  0x90   :  { %v143_v17 = vsel %vm142_vm4, %v139_v16, %v1745_v11  ;;  %v144_v27 = vsel %vm142_vm4, %v140_v21, %v1746_v22  ;;  %v459_v11 = vld [vmem:[%s3032_s2 + $0x48] sm:$0xff]  ;;  %v457_v16 = vld [vmem:[%s3032_s2 + $0x38] sm:$0xff]  ;;  %v466_v21 = vld [vmem:[%s3032_s2 + $0x80] sm:$0xff] }
  0x91   :  { %v147_v18 = vsel %vm146_vm5, %v143_v17, %v126_v8  ;;  %v148_v30 = vsel %vm146_vm5, %v144_v27, %v128_v5  ;;  %v454_v22 = vld [vmem:[%s3032_s2 + $0x20] sm:$0xff]  ;;  %506 = vmatpush.msrb.mxu3 %v466_v21  ;;  %v452_v27 = vld [vmem:[%s3032_s2 + $0x10] sm:$0xff] }
  0x92   :  { %297 = vmatmul.f32.vlgmr.msra.gmra.mxu0 %v147_v18  ;;  %367 = vmatmul.f32.vlgmr.msra.gmra.mxu2 %v147_v18  ;;  %v456_v18 = vld [vmem:[%s3032_s2 + $0x30] sm:$0xff] }
  0x93   :  { %v1759_v26 = vpop.permute.xlu1 %1758 }
  0x94   :  { %1676 = vmatmul.msk.f32.gmra.mxu1 %vm261_vm1, %v128_v5  ;;  %1683 = vmatmul.msk.f32.gmra.mxu3 %vm261_vm1, %v128_v5  ;;  %v1760_v31 = vunpack.i.l.bf16 %v1759_v26  ;;  %v1761_v42 = vunpack.i.h.bf16 %v1759_v26  ;;  %v462_v5 = vld [vmem:[%s3032_s2 + $0x60] sm:$0xff] }
  0x95   :  { %v1754_v25 = vpop.permute.xlu0 %1753  ;;  %474 = vmatpush.msrb.mxu1 %v462_v5  ;;  %565 = vmatpush.msrb.mxu0 %v462_v5 }
  0x96   :  { %v1755_v28 = vunpack.i.l.bf16 %v1754_v25  ;;  %v1756_v37 = vunpack.i.h.bf16 %v1754_v25  ;;  %v453_v25 = vld [vmem:[%s3032_s2 + $0x18] sm:$0xff] }
  0x97   :  { %475 = vmatpush.msrb.mxu1 %v461_v6  ;;  %566 = vmatpush.msrb.mxu0 %v461_v6 }
  0x98   :  { %v141_v33 = vsel %vm138_vm3, %v137_v29, %v1755_v28  ;;  %v216_v43 = vsel %vm138_vm3, %v213_v40, %v1756_v37  ;;  %v451_v28 = vld [vmem:[%s3032_s2 + $0x8] sm:$0xff] }
  0x99   :  { %v145_v36 = vsel %vm142_vm4, %v141_v33, %v1760_v31  ;;  %v219_v47 = vsel %vm142_vm4, %v216_v43, %v1761_v42  ;;  %476 = vmatpush.msrb.mxu1 %v460_v10  ;;  %567 = vmatpush.msrb.mxu0 %v460_v10 }
  0x9a   :  { %300 = vmatmul.f32.gmra.mxu0 %v148_v30  ;;  %370 = vmatmul.f32.gmra.mxu2 %v148_v30  ;;  %v149_v41 = vsel %vm146_vm5, %v145_v36, %v130_v32  ;;  %v450_v30 = vld [vmem:[%s3032_s2] sm:$0xff]  ;;  %s3036_s2 = sld [smem:[#allocation12_spill]] }
  0x9b   :  { %v1764_v39 = vpop.permute.xlu1 %1763  ;;  %477 = vmatpush.msrb.mxu1 %v459_v11  ;;  %568 = vmatpush.msrb.mxu0 %v459_v11 }
  0x9c   :  { %1677 = vmatmul.msk.f32.gmra.mxu1 %vm261_vm1, %v130_v32  ;;  %1684 = vmatmul.msk.f32.gmra.mxu3 %vm261_vm1, %v130_v32  ;;  %v1765_v44 = vunpack.i.l.bf16 %v1764_v39  ;;  %v1766_v53 = vunpack.i.h.bf16 %v1764_v39 }
  0x9d   :  { %v205_v38 = vpop.permute.xlu0 %204  ;;  %478 = vmatpush.msrb.mxu1 %v458_v12  ;;  %569 = vmatpush.msrb.mxu0 %v458_v12 }
  0x9e   :  { %v214_v48 = vsel %vm134_vm2, %v151_v45, %v1765_v44  ;;  %v222_v51 = vsel %vm146_vm5, %v219_v47, %v205_v38  ;;  %v215_v56 = vsel %vm134_vm2, %v152_v54, %v1766_v53 }
  0x9f   :  { %v217_v52 = vsel %vm138_vm3, %v214_v48, %v183_v46  ;;  %v218_v59 = vsel %vm138_vm3, %v215_v56, %v185_v57  ;;  %479 = vmatpush.msrb.mxu1 %v457_v16  ;;  %570 = vmatpush.msrb.mxu0 %v457_v16 }
  0xa1   :  { %480 = vmatpush.msrb.mxu1 %v456_v18  ;;  %571 = vmatpush.msrb.mxu0 %v456_v18 }
  0xa2   :  { %303 = vmatmul.f32.gmra.mxu0 %v149_v41  ;;  %373 = vmatmul.f32.gmra.mxu2 %v149_v41 }
  0xa3   :  { %v207_v50 = vpop.permute.xlu1 %206  ;;  %481 = vmatpush.msrb.mxu1 %v455_v19  ;;  %572 = vmatpush.msrb.mxu0 %v455_v19 }
  0xa4   :  { %1678 = vmatmul.msk.f32.gmra.mxu1 %vm261_vm1, %v205_v38  ;;  %1685 = vmatmul.msk.f32.gmra.mxu3 %vm261_vm1, %v205_v38 }
  0xa5   :  { %v195_v49 = vpop.permute.xlu0 %194  ;;  %482 = vmatpush.msrb.mxu1 %v454_v22  ;;  %573 = vmatpush.msrb.mxu0 %v454_v22 }
  0xa6   :  { %v220_v55 = vsel %vm142_vm4, %v217_v52, %v195_v49 }
  0xa7   :  { %v223_v58 = vsel %vm146_vm5, %v220_v55, %v207_v50  ;;  %483 = vmatpush.msrb.mxu1 %v453_v25  ;;  %574 = vmatpush.msrb.mxu0 %v453_v25 }
  0xa9   :  { %484 = vmatpush.msrb.mxu1 %v452_v27  ;;  %575 = vmatpush.msrb.mxu0 %v452_v27 }
  0xaa   :  { %306 = vmatmul.f32.gmra.mxu0 %v222_v51  ;;  %376 = vmatmul.f32.gmra.mxu2 %v222_v51 }
  0xab   :  { %v209_v61 = vpop.permute.xlu1 %208  ;;  %485 = vmatpush.msrb.mxu1 %v451_v28  ;;  %576 = vmatpush.msrb.mxu0 %v451_v28 }
  0xac   :  { %1679 = vmatmul.msk.f32.gmra.mxu1 %vm261_vm1, %v207_v50  ;;  %1686 = vmatmul.msk.f32.gmra.mxu3 %vm261_vm1, %v207_v50 }
  0xad   :  { %v197_v60 = vpop.permute.xlu0 %196  ;;  %486 = vmatpush.msrb.mxu1 %v450_v30  ;;  %577 = vmatpush.msrb.mxu0 %v450_v30 }
  0xae   :  { %v221_v62 = vsel %vm142_vm4, %v218_v59, %v197_v60 }
  0xaf   :  { %v224_v63 = vsel %vm146_vm5, %v221_v62, %v209_v61  ;;  %596 = vmatpush.msra.mxu1 %v2183_v1 }
  0xb1   :  { %597 = vmatpush.msra.mxu1 %v466_v21 }
  0xb2   :  { %309 = vmatmul.f32.gmra.mxu0 %v223_v58  ;;  %379 = vmatmul.f32.gmra.mxu2 %v223_v58 }
  0xb4   :  { %1680 = vmatmul.msk.f32.gmra.mxu1 %vm261_vm1, %v209_v61  ;;  %1687 = vmatmul.msk.f32.gmra.mxu3 %vm261_vm1, %v209_v61  ;;  %vm1078_vm1 = vcmask 850944  }
  0xba   :  { %312 = vmatmul.f32.gmra.mxu0 %v224_v63  ;;  %382 = vmatmul.f32.gmra.mxu2 %v224_v63 }
 0x109   :  { %v2189_v3 = vpop.f32.mrf.mxu1 }
 0x10f   :  { %v298_v7 = vpop.f32.mrf.mxu0  ;;  %v403_v8 = vpop.f32.mrf.mxu3 }
 0x110   :  { %v2240_v36 = vadd.f32 %v2189_v3, %v298_v7 }
 0x111   :  { %v336_v9 = vpop.f32.mrf.mxu1 }
 0x112   :  { %v519_v45 = vmul.f32 %v2240_v36, %v2240_v36 }
 0x115   :  { %v368_v13 = vpop.f32.mrf.mxu2 }
 0x116   :  { %v2250_v42 = vadd.f32 %v403_v8, %v368_v13 }
 0x117   :  { %v301_v14 = vpop.f32.mrf.mxu0  ;;  %v406_v15 = vpop.f32.mrf.mxu3 }
 0x118   :  { %v2237_v34 = vadd.f32 %v336_v9, %v301_v14  ;;  %v520_v54 = vmul.f32 %v2250_v42, %v2250_v42  ;;  %v433_v63 = vsel %vm432_vm6, %v2250_v42, 0.0 }
 0x119   :  { %v339_v17 = vpop.f32.mrf.mxu1 }
 0x11a   :  { %v521_v40 = vmul.f32 %v2237_v34, %v2237_v34  ;;  %v421_v46 = vadd.f32 %v2237_v34, %v2240_v36  ;;  %v542_v7 = vsel %vm432_vm6, %v520_v54, 0.0 }
 0x11c   :  { %v531_v50 = vadd.f32 %v521_v40, %v519_v45 }
 0x11d   :  { %v371_v20 = vpop.f32.mrf.mxu2 }
 0x11e   :  { %v2244_v38 = vadd.f32 %v406_v15, %v371_v20 }
 0x11f   :  { %v304_v23 = vpop.f32.mrf.mxu0  ;;  %v409_v24 = vpop.f32.mrf.mxu3 }
 0x120   :  { %v2242_v37 = vadd.f32 %v339_v17, %v304_v23  ;;  %v522_v49 = vmul.f32 %v2244_v38, %v2244_v38  ;;  %v434_v55 = vsel %vm432_vm6, %v2244_v38, 0.0 }
 0x121   :  { %v342_v26 = vpop.f32.mrf.mxu1  ;;  %v435_v8 = vadd.f32 %v434_v55, %v433_v63 }
 0x122   :  { %v523_v47 = vmul.f32 %v2242_v37, %v2242_v37  ;;  %v422_v51 = vadd.f32 %v421_v46, %v2242_v37  ;;  %v543_v0 = vsel %vm432_vm6, %v522_v49, 0.0 }
 0x123   :  { %v544_v15 = vadd.f32 %v543_v0, %v542_v7 }
 0x124   :  { %v532_v59 = vadd.f32 %v531_v50, %v523_v47 }
 0x125   :  { %v374_v29 = vpop.f32.mrf.mxu2 }
 0x126   :  { %v2252_v43 = vadd.f32 %v409_v24, %v374_v29 }
 0x127   :  { %v307_v31 = vpop.f32.mrf.mxu0  ;;  %v412_v32 = vpop.f32.mrf.mxu3 }
 0x128   :  { %v2248_v41 = vadd.f32 %v342_v26, %v307_v31  ;;  %v524_v56 = vmul.f32 %v2252_v43, %v2252_v43  ;;  %v436_v1 = vsel %vm432_vm6, %v2252_v43, 0.0 }
 0x129   :  { %v345_v33 = vpop.f32.mrf.mxu1  ;;  %v437_v16 = vadd.f32 %v436_v1, %v435_v8 }
 0x12a   :  { %v525_v52 = vmul.f32 %v2248_v41, %v2248_v41  ;;  %v423_v60 = vadd.f32 %v422_v51, %v2248_v41  ;;  %v545_v9 = vsel %vm432_vm6, %v524_v56, 0.0 }
 0x12b   :  { %v546_v22 = vadd.f32 %v545_v9, %v544_v15 }
 0x12c   :  { %v533_v3 = vadd.f32 %v532_v59, %v525_v52 }
 0x12d   :  { %v377_v35 = vpop.f32.mrf.mxu2 }
 0x12e   :  { %v2267_v53 = vadd.f32 %v412_v32, %v377_v35 }
 0x12f   :  { %v310_v39 = vpop.f32.mrf.mxu0  ;;  %v415_v44 = vpop.f32.mrf.mxu3 }
 0x130   :  { %v2260_v48 = vadd.f32 %v345_v33, %v310_v39  ;;  %v526_v4 = vmul.f32 %v2267_v53, %v2267_v53  ;;  %v438_v10 = vsel %vm432_vm6, %v2267_v53, 0.0 }
 0x131   :  { %v348_v58 = vpop.f32.mrf.mxu1  ;;  %v439_v23 = vadd.f32 %v438_v10, %v437_v16 }
 0x132   :  { %v527_v61 = vmul.f32 %v2260_v48, %v2260_v48  ;;  %v424_v5 = vadd.f32 %v423_v60, %v2260_v48  ;;  %v547_v18 = vsel %vm432_vm6, %v526_v4, 0.0  ;;  %v1798_v4 = vmov 1152.0  }
 0x133   :  { %v548_v29 = vadd.f32 %v547_v18, %v546_v22  ;;  %1776 = vrcp.f32 %v1798_v4  ;;  %v761_v4 = vld [vmem:[%s3034_s29 + $0x20] sm:$0xff] }
 0x134   :  { %v534_v11 = vadd.f32 %v533_v3, %v527_v61 }
 0x135   :  { %v380_v57 = vpop.f32.mrf.mxu2 }
 0x136   :  { %v2278_v62 = vadd.f32 %v415_v44, %v380_v57 }
 0x137   :  { %v313_v2 = vpop.f32.mrf.mxu0  ;;  %v418_v17 = vpop.f32.mrf.mxu3 }
 0x138   :  { %v2288_v6 = vadd.f32 %v348_v58, %v313_v2  ;;  %v528_v12 = vmul.f32 %v2278_v62, %v2278_v62  ;;  %v440_v19 = vsel %vm432_vm6, %v2278_v62, 0.0 }
 0x139   :  { %v441_v30 = vadd.f32 %v440_v19, %v439_v23 }
 0x13a   :  { %v425_v13 = vadd.f32 %v424_v5, %v2288_v6  ;;  %v529_v14 = vmul.f32 %v2288_v6, %v2288_v6  ;;  %v549_v25 = vsel %vm432_vm6, %v528_v12, 0.0  ;;  %v1777_v5 = vpop.eup %1776 }
 0x13b   :  { %v550_v39 = vadd.f32 %v549_v25, %v548_v29  ;;  %v512_v7 = vmul.f32 1152.0, %v1777_v5  ;;  %vm516_vm8 = vweird.f32 %v1777_v5  ;;  %v771_v25 = vld [vmem:[%s3034_s29 + $0x70] sm:$0xff]  ;;  %v769_v29 = vld [vmem:[%s3034_s29 + $0x60] sm:$0xff] }
 0x13c   :  { %v426_v20 = vrot.slane %v425_v13, 4  ;;  %v535_v21 = vadd.f32 %v534_v11, %v529_v14  ;;  %v621_v11 = vld [vmem:[%s3033_s1] sm:$0x3f]  ;;  %v622_v14 = vld [vmem:[%s3033_s1 + $0x8] sm:$0x3f] }
 0x13d   :  { %v383_v24 = vpop.f32.mrf.mxu2  ;;  %v513_v9 = vsub.f32 1.0, %v512_v7  ;;  %1690 = vmatpush.msk.msra.mxu3 %vm627_vm7, %v621_v11  ;;  %v760_v7 = vld [vmem:[%s3034_s29 + $0x18] sm:$0xff] }
 0x13e   :  { %v427_v26 = vadd.f32 %v426_v20, %v425_v13  ;;  %v536_v27 = vrot.slane %v535_v21, 4  ;;  %v2303_v28 = vadd.f32 %v418_v17, %v383_v24  ;;  %v772_v24 = vld [vmem:[%s3034_s29 + $0x78] sm:$0xff] }
 0x13f   :  { %v514_v10 = vmul.f32 %v1777_v5, %v513_v9  ;;  %793 = vmatpush.msrb.mxu2 %v772_v24  ;;  %v759_v9 = vld [vmem:[%s3034_s29 + $0x10] sm:$0xff] }
 0x140   :  { %v442_v31 = vsel %vm432_vm6, %v2303_v28, 0.0  ;;  %v530_v32 = vmul.f32 %v2303_v28, %v2303_v28  ;;  %v428_v33 = vrot.slane %v427_v26, 2  ;;  %v537_v35 = vadd.f32 %v536_v27, %v535_v21  ;;  %v770_v27 = vld [vmem:[%s3034_s29 + $0x68] sm:$0xff] }
 0x141   :  { %v443_v40 = vadd.f32 %v442_v31, %v441_v30  ;;  %v515_v12 = vadd.f32 %v1777_v5, %v514_v10  ;;  %794 = vmatpush.msrb.mxu2 %v771_v25  ;;  %v768_v30 = vld [vmem:[%s3034_s29 + $0x58] sm:$0xff]  ;;  %v767_v31 = vld [vmem:[%s3034_s29 + $0x50] sm:$0xff]  ;;  %v774_v10 = vld [vmem:[%s3034_s29 + $0x88] sm:$0xff] }
 0x142   :  { %v551_v44 = vsel %vm432_vm6, %v530_v32, 0.0  ;;  %v429_v45 = vadd.f32 %v428_v33, %v427_v26  ;;  %v538_v46 = vrot.slane %v537_v35, 2  ;;  %v766_v33 = vld [vmem:[%s3034_s29 + $0x48] sm:$0xff] }
 0x143   :  { %v444_v47 = vrot.slane %v443_v40, 4  ;;  %v552_v49 = vadd.f32 %v551_v44, %v550_v39  ;;  %v517_v19 = vsel %vm516_vm8, %v1777_v5, %v515_v12  ;;  %795 = vmatpush.msrb.mxu2 %v770_v27  ;;  %v765_v39 = vld [vmem:[%s3034_s29 + $0x40] sm:$0xff]  ;;  %v764_v44 = vld [vmem:[%s3034_s29 + $0x38] sm:$0xff]  ;;  %v869_v5 = vld [vmem:[%s3036_s2 + $0x30] sm:$0xff]  ;;  %vm1486_vm8 = vcmask 975872  }
 0x144   :  { %v430_v50 = vrot.slane %v429_v45, 1  ;;  %v539_v51 = vadd.f32 %v538_v46, %v537_v35  ;;  %v880_v12 = vld [vmem:[%s3036_s2 + $0x88] sm:$0xff] }
 0x145   :  { %v445_v52 = vadd.f32 %v444_v47, %v443_v40  ;;  %v553_v54 = vrot.slane %v552_v49, 4  ;;  %796 = vmatpush.msrb.mxu2 %v769_v29  ;;  %930 = vmatpush.msra.mxu0 %v880_v12 }
 0x146   :  { %v431_v55 = vadd.f32 %v430_v50, %v429_v45  ;;  %v540_v56 = vrot.slane %v539_v51, 1 }
 0x147   :  { %v446_v57 = vrot.slane %v445_v52, 2  ;;  %v554_v58 = vadd.f32 %v553_v54, %v552_v49  ;;  %797 = vmatpush.msrb.mxu2 %v768_v30  ;;  %v616_v49 = vld [vmem:[%s3035_s28] sm:$0x1]  ;;  %v877_v54 = vld [vmem:[%s3036_s2 + $0x70] sm:$0xff] }
 0x148   :  { %487 = vmatmul.f32.vlgmr.msrb.gmra.mxu1 %v431_v55  ;;  %v541_v59 = vadd.f32 %v540_v56, %v539_v51  ;;  %v876_v56 = vld [vmem:[%s3036_s2 + $0x68] sm:$0xff] }
 0x149   :  { %v555_v60 = vrot.slane %v554_v58, 2  ;;  %v447_v61 = vadd.f32 %v446_v57, %v445_v52  ;;  %1692 = vmatpush.msk.msrb.mxu1 %vm627_vm7, %v622_v14  ;;  %798 = vmatpush.msrb.mxu2 %v767_v31  ;;  %v878_v52 = vld [vmem:[%s3036_s2 + $0x78] sm:$0xff]  ;;  %v618_v57 = vld [vmem:[%s2995_s5] sm:$0x1] }
 0x14a   :  { %578 = vmatmul.f32.vlgmr.msrb.gmra.mxu0 %v541_v59 }
 0x14b   :  { %v556_v63 = vadd.f32 %v555_v60, %v554_v58  ;;  %v448_v0 = vrot.slane %v447_v61, 1  ;;  %799 = vmatpush.msrb.mxu2 %v766_v33  ;;  %v875_v58 = vld [vmem:[%s3036_s2 + $0x60] sm:$0xff]  ;;  %v874_v60 = vld [vmem:[%s3036_s2 + $0x58] sm:$0xff] }
 0x14d   :  { %v449_v1 = vadd.f32 %v448_v0, %v447_v61  ;;  %v557_v2 = vrot.slane %v556_v63, 1  ;;  %800 = vmatpush.msrb.mxu2 %v765_v39  ;;  %v873_v61 = vld [vmem:[%s3036_s2 + $0x50] sm:$0xff]  ;;  %v872_v0 = vld [vmem:[%s3036_s2 + $0x48] sm:$0xff] }
 0x14f   :  { %1688 = vmatmul.msk.f32.vlgmr.msrb.gmra.mxu3 %vm432_vm6, %v449_v1  ;;  %v558_v3 = vadd.f32 %v557_v2, %v556_v63  ;;  %801 = vmatpush.msrb.mxu2 %v764_v44  ;;  %v763_v63 = vld [vmem:[%s3034_s29 + $0x30] sm:$0xff]  ;;  %v762_v1 = vld [vmem:[%s3034_s29 + $0x28] sm:$0xff]  ;;  %v871_v2 = vld [vmem:[%s3036_s2 + $0x40] sm:$0xff] }
 0x150   :  { %1694 = vmatpush.msk.msrb.mxu3 %vm627_vm7, %v621_v11  ;;  %v867_v11 = vld [vmem:[%s3036_s2 + $0x20] sm:$0xff] }
 0x151   :  { %1689 = vmatmul.msk.f32.vlgmr.msra.gmra.mxu1 %vm432_vm6, %v558_v3  ;;  %802 = vmatpush.msrb.mxu2 %v763_v63  ;;  %v870_v3 = vld [vmem:[%s3036_s2 + $0x38] sm:$0xff] }
 0x152   :  { %1696 = vmatpush.msk.msra.mxu1 %vm627_vm7, %v622_v14  ;;  %v866_v14 = vld [vmem:[%s3036_s2 + $0x18] sm:$0xff] }
 0x153   :  { %803 = vmatpush.msrb.mxu2 %v762_v1 }
 0x155   :  { %804 = vmatpush.msrb.mxu2 %v761_v4 }
 0x157   :  { %805 = vmatpush.msrb.mxu2 %v760_v7 }
 0x159   :  { %806 = vmatpush.msrb.mxu2 %v759_v9 }
 0x1c5   :  { %v488_v8 = vpop.f32.mrf.mxu1 }
 0x1c7   :  { %v579_v15 = vpop.f32.mrf.mxu0 }
 0x1ce   :  { %v599_v13 = vpop.f32.mrf.mxu1 }
 0x1cf   :  { %v600_v17 = vadd.f32 %v599_v13, %v579_v15  ;;  %v773_v13 = vld [vmem:[%s3034_s29 + $0x80] sm:$0xff] }
 0x1d0   :  { %v879_v15 = vld [vmem:[%s3036_s2 + $0x80] sm:$0xff] }
 0x1d1   :  { %v602_v21 = vmul.f32 %v600_v17, %v517_v19  ;;  %931 = vmatpush.msra.mxu0 %v879_v15  ;;  %v865_v17 = vld [vmem:[%s3036_s2 + $0x10] sm:$0xff] }
 0x1d2   :  { %v508_v16 = vpop.f32.mrf.mxu3 }
 0x1d3   :  { %v509_v18 = vadd.f32 %v508_v16, %v488_v8  ;;  %v868_v8 = vld [vmem:[%s3036_s2 + $0x28] sm:$0xff] }
 0x1d4   :  { %v758_v16 = vld [vmem:[%s3034_s29 + $0x8] sm:$0xff] }
 0x1d5   :  { %v518_v20 = vmul.f32 %v517_v19, %v509_v18  ;;  %v757_v18 = vld [vmem:[%s3034_s29] sm:$0xff]  ;;  %807 = vmatpush.msrb.mxu2 %v758_v16  ;;  %v864_v19 = vld [vmem:[%s3036_s2 + $0x8] sm:$0xff]  ;;  %s1799_s29 = smov 88  }
 0x1d7   :  { %v603_v22 = vmul.f32 %v518_v20, %v518_v20  ;;  %808 = vmatpush.msrb.mxu2 %v757_v18 }
 0x1d9   :  { %v604_v23 = vsub.f32 %v602_v21, %v603_v22 }
 0x1db   :  { %v605_v26 = vadd.f32 1e-05, %v604_v23 }
 0x1dd   :  { %1778 = vrsqrt.f32 %v605_v26  ;;  %vm612_vm10 = vweird.f32 %v605_v26 }
 0x1e3   :  { %v1779_v32 = vpop.eup %1778 }
 0x1e4   :  { %v607_v35 = vmul.f32 %v1779_v32, %v605_v26  ;;  %vm613_vm9 = vweird.f32 %v1779_v32 }
 0x1e5   :  { %vm614_vm11 = vmor %vm612_vm10, %vm613_vm9 }
 0x1e6   :  { %v608_v40 = vmul.f32 %v1779_v32, %v607_v35 }
 0x1e8   :  { %v609_v45 = vmul.f32 0.5, %v608_v40 }
 0x1ea   :  { %v610_v46 = vsub.f32 1.5, %v609_v45 }
 0x1ec   :  { %v611_v47 = vmul.f32 %v1779_v32, %v610_v46 }
 0x1ee   :  { %v615_v50 = vsel %vm614_vm11, %v1779_v32, %v611_v47 }
 0x1ef   :  { %v617_v51 = vmul.f32 %v616_v49, %v615_v50 }
 0x1f1   :  { %1691 = vmatmul.msk.f32.vlgmr.msra.gmra.mxu3 %vm623_vm12, %v617_v51  ;;  %1693 = vmatmul.msk.f32.vlgmr.msrb.gmra.mxu1 %vm623_vm12, %v617_v51  ;;  %v619_v55 = vmul.f32 %v617_v51, %v518_v20  ;;  %v863_v20 = vld [vmem:[%s3036_s2] sm:$0xff]  ;;  %s1800_s2 = smov 16  }
 0x1f2   :  { %881 = vmatpush.msrb.mxu1 %v878_v52  ;;  %842 = vmatpush.msra.mxu3 %v774_v10 }
 0x1f3   :  { %v620_v59 = vsub.f32 %v618_v57, %v619_v55 }
 0x1f4   :  { %882 = vmatpush.msrb.mxu1 %v877_v54  ;;  %843 = vmatpush.msra.mxu3 %v773_v13 }
 0x1f6   :  { %883 = vmatpush.msrb.mxu1 %v876_v56 }
 0x1f8   :  { %884 = vmatpush.msrb.mxu1 %v875_v58 }
 0x1f9   :  { %1695 = vmatmul.msk.f32.vlgmr.msrb.gmra.mxu3 %vm623_vm12, %v620_v59  ;;  %1697 = vmatmul.msk.f32.vlgmr.msra.gmra.mxu1 %vm623_vm12, %v620_v59  ;;  %vm1556_vm12 = vcmask 982016  }
 0x1fa   :  { %885 = vmatpush.msrb.mxu1 %v874_v60 }
 0x1fc   :  { %886 = vmatpush.msrb.mxu1 %v873_v61 }
 0x1fe   :  { %887 = vmatpush.msrb.mxu1 %v872_v0 }
 0x200   :  { %888 = vmatpush.msrb.mxu1 %v871_v2 }
 0x202   :  { %889 = vmatpush.msrb.mxu1 %v870_v3 }
 0x204   :  { %890 = vmatpush.msrb.mxu1 %v869_v5 }
 0x206   :  { %891 = vmatpush.msrb.mxu1 %v868_v8 }
 0x208   :  { %892 = vmatpush.msrb.mxu1 %v867_v11 }
 0x20a   :  { %893 = vmatpush.msrb.mxu1 %v866_v14 }
 0x20c   :  { %894 = vmatpush.msrb.mxu1 %v865_v17 }
 0x20e   :  { %895 = vmatpush.msrb.mxu1 %v864_v19 }
 0x210   :  { %896 = vmatpush.msrb.mxu1 %v863_v20 }
 0x26e   :  { %v671_v21 = vpop.f32.mrf.mxu1 }
 0x26f   :  { %v675_v22 = vperm.slane %v671_v21, 0 }
 0x271   :  { %v677_v26 = vmul.f32 %v675_v22, %v2250_v42  ;;  %v679_v35 = vmul.f32 %v675_v22, %v2244_v38  ;;  %v681_v47 = vmul.f32 %v675_v22, %v2252_v43 }
 0x274   :  { %v651_v23 = vpop.f32.mrf.mxu3 }
 0x275   :  { %v674_v27 = vperm.slane %v651_v23, 0 }
 0x276   :  { %v728_v24 = vpop.f32.mrf.mxu1 }
 0x277   :  { %v732_v25 = vperm.slane %v728_v24, 0  ;;  %v676_v33 = vmul.f32 %v674_v27, %v2240_v36  ;;  %v678_v42 = vmul.f32 %v674_v27, %v2237_v34  ;;  %v680_v38 = vmul.f32 %v674_v27, %v2242_v37 }
 0x278   :  { %v683_v34 = vmul.f32 %v675_v22, %v2267_v53  ;;  %v682_v43 = vmul.f32 %v674_v27, %v2248_v41  ;;  %v685_v37 = vmul.f32 %v675_v22, %v2278_v62  ;;  %v684_v53 = vmul.f32 %v674_v27, %v2260_v48 }
 0x279   :  { %v734_v29 = vadd.f32 %v732_v25, %v677_v26  ;;  %v736_v40 = vadd.f32 %v732_v25, %v679_v35  ;;  %v738_v49 = vadd.f32 %v732_v25, %v681_v47  ;;  %v687_v41 = vmul.f32 %v675_v22, %v2303_v28 }
 0x27a   :  { %v740_v52 = vadd.f32 %v732_v25, %v683_v34  ;;  %v742_v57 = vadd.f32 %v732_v25, %v685_v37  ;;  %v686_v62 = vmul.f32 %v674_v27, %v2288_v6  ;;  %v1064_v37 = vld [vmem:[%s2996_s8 + $0xf8] sm:$0xff] }
 0x27b   :  { %v746_v30 = vmax.f32 %v734_v29, 0.0  ;;  %v748_v45 = vmax.f32 %v736_v40, 0.0  ;;  %v750_v36 = vmax.f32 %v738_v49, 0.0  ;;  %v744_v61 = vadd.f32 %v732_v25, %v687_v41  ;;  %1108 = vmatpush.msra.mxu2 %v1064_v37 }
 0x27c   :  { %v708_v31 = vpop.f32.mrf.mxu3  ;;  %v752_v55 = vmax.f32 %v740_v52, 0.0  ;;  %v754_v59 = vmax.f32 %v742_v57, 0.0  ;;  %v1047_v57 = vld [vmem:[%s2996_s8 + $0x70] sm:$0xff] }
 0x27d   :  { %v731_v32 = vperm.slane %v708_v31, 0  ;;  %1698 = vmatmul.msk.f32.vlgmr.msra.gmra.mxu3 %vm432_vm6, %v746_v30  ;;  %1704 = vmatmul.msk.f32.vlgmr.msra.gmra.mxu0 %vm432_vm6, %v746_v30  ;;  %v756_v0 = vmax.f32 %v744_v61, 0.0 }
 0x27f   :  { %v733_v39 = vadd.f32 %v731_v32, %v676_v33  ;;  %v735_v46 = vadd.f32 %v731_v32, %v678_v42  ;;  %v737_v51 = vadd.f32 %v731_v32, %v680_v38  ;;  %v739_v56 = vadd.f32 %v731_v32, %v682_v43 }
 0x280   :  { %v741_v60 = vadd.f32 %v731_v32, %v684_v53  ;;  %v743_v1 = vadd.f32 %v731_v32, %v686_v62  ;;  %v1062_v53 = vld [vmem:[%s2996_s8 + $0xe8] sm:$0xff]  ;;  %v1061_v62 = vld [vmem:[%s2996_s8 + $0xe0] sm:$0xff] }
 0x281   :  { %v745_v44 = vmax.f32 %v733_v39, 0.0  ;;  %v747_v50 = vmax.f32 %v735_v46, 0.0  ;;  %v749_v54 = vmax.f32 %v737_v51, 0.0  ;;  %v751_v58 = vmax.f32 %v739_v56, 0.0  ;;  %v1048_v56 = vld [vmem:[%s2996_s8 + $0x78] sm:$0xff] }
 0x282   :  { %v753_v63 = vmax.f32 %v741_v60, 0.0  ;;  %v755_v48 = vmax.f32 %v743_v1, 0.0  ;;  %1085 = vmatpush.msrb.mxu3 %v1048_v56  ;;  %v1077_v60 = vld [vmem:[%s2996_s8 + $0x160] sm:$0xff]  ;;  %v1076_v1 = vld [vmem:[%s2996_s8 + $0x158] sm:$0xff] }
 0x283   :  { %809 = vmatmul.f32.vlgmr.msrb.gmra.mxu2 %v745_v44  ;;  %897 = vmatmul.f32.vlgmr.msrb.gmra.mxu1 %v745_v44 }
 0x284   :  { %1086 = vmatpush.msrb.mxu3 %v1047_v57  ;;  %1134 = vmatpush.msrb.mxu0 %v1077_v60 }
 0x285   :  { %1699 = vmatmul.msk.f32.gmra.mxu3 %vm432_vm6, %v748_v45  ;;  %1705 = vmatmul.msk.f32.gmra.mxu0 %vm432_vm6, %v748_v45 }
 0x286   :  { %1135 = vmatpush.msrb.mxu0 %v1076_v1  ;;  %v1174_v1 = vld [vmem:[%s2997_s9 + $0x68] sm:$0xff] }
 0x28b   :  { %812 = vmatmul.f32.gmra.mxu2 %v747_v50  ;;  %900 = vmatmul.f32.gmra.mxu1 %v747_v50 }
 0x28d   :  { %1700 = vmatmul.msk.f32.gmra.mxu3 %vm432_vm6, %v750_v36  ;;  %1706 = vmatmul.msk.f32.gmra.mxu0 %vm432_vm6, %v750_v36 }
 0x293   :  { %815 = vmatmul.f32.gmra.mxu2 %v749_v54  ;;  %903 = vmatmul.f32.gmra.mxu1 %v749_v54 }
 0x295   :  { %1701 = vmatmul.msk.f32.gmra.mxu3 %vm432_vm6, %v752_v55  ;;  %1707 = vmatmul.msk.f32.gmra.mxu0 %vm432_vm6, %v752_v55 }
 0x29b   :  { %818 = vmatmul.f32.gmra.mxu2 %v751_v58  ;;  %906 = vmatmul.f32.gmra.mxu1 %v751_v58  ;;  %v1063_v58 = vld [vmem:[%s2996_s8 + $0xf0] sm:$0xff] }
 0x29c   :  { %1109 = vmatpush.msra.mxu2 %v1063_v58 }
 0x29d   :  { %1702 = vmatmul.msk.f32.gmra.mxu3 %vm432_vm6, %v754_v59  ;;  %1708 = vmatmul.msk.f32.gmra.mxu0 %vm432_vm6, %v754_v59  ;;  %v1046_v59 = vld [vmem:[%s2996_s8 + $0x68] sm:$0xff] }
 0x29e   :  { %1087 = vmatpush.msrb.mxu3 %v1046_v59  ;;  %1110 = vmatpush.msra.mxu2 %v1062_v53 }
 0x2a0   :  { %1111 = vmatpush.msra.mxu2 %v1061_v62  ;;  %v1175_v62 = vld [vmem:[%s2997_s9 + $0x70] sm:$0xff] }
 0x2a3   :  { %821 = vmatmul.f32.gmra.mxu2 %v753_v63  ;;  %909 = vmatmul.f32.gmra.mxu1 %v753_v63 }
 0x2a5   :  { %1703 = vmatmul.msk.f32.gmra.mxu3 %vm432_vm6, %v756_v0  ;;  %1709 = vmatmul.msk.f32.gmra.mxu0 %vm432_vm6, %v756_v0  ;;  %v1045_v0 = vld [vmem:[%s2996_s8 + $0x60] sm:$0xff] }
 0x2a6   :  { %1088 = vmatpush.msrb.mxu3 %v1045_v0 }
 0x2ab   :  { %824 = vmatmul.f32.gmra.mxu2 %v755_v48  ;;  %912 = vmatmul.f32.gmra.mxu1 %v755_v48 }
 0x2fa   :  { %v933_v2 = vpop.f32.mrf.mxu0 }
 0x300   :  { %v845_v3 = vpop.f32.mrf.mxu3  ;;  %v898_v4 = vpop.f32.mrf.mxu1 }
 0x301   :  { %v934_v7 = vadd.f32 %v933_v2, %v898_v4  ;;  %v1075_v2 = vld [vmem:[%s2996_s8 + $0x150] sm:$0xff]  ;;  %v1060_v4 = vld [vmem:[%s2996_s8 + $0xd8] sm:$0xff] }
 0x302   :  { %v936_v5 = vpop.f32.mrf.mxu0  ;;  %1136 = vmatpush.msrb.mxu0 %v1075_v2  ;;  %1112 = vmatpush.msra.mxu2 %v1060_v4  ;;  %v1172_v2 = vld [vmem:[%s2997_s9 + $0x58] sm:$0xff]  ;;  %v1170_v4 = vld [vmem:[%s2997_s9 + $0x48] sm:$0xff] }
 0x306   :  { %v810_v28 = vpop.f32.mrf.mxu2 }
 0x307   :  { %v846_v8 = vadd.f32 %v845_v3, %v810_v28  ;;  %v1044_v3 = vld [vmem:[%s2996_s8 + $0x58] sm:$0xff]  ;;  %v1043_v28 = vld [vmem:[%s2996_s8 + $0x50] sm:$0xff] }
 0x308   :  { %v848_v9 = vpop.f32.mrf.mxu3  ;;  %v901_v10 = vpop.f32.mrf.mxu1  ;;  %1089 = vmatpush.msrb.mxu3 %v1044_v3  ;;  %v1171_v3 = vld [vmem:[%s2997_s9 + $0x50] sm:$0xff] }
 0x309   :  { %v951_v11 = vmax.f32 %v846_v8, %v934_v7  ;;  %v937_v12 = vadd.f32 %v936_v5, %v901_v10  ;;  %v1074_v5 = vld [vmem:[%s2996_s8 + $0x148] sm:$0xff]  ;;  %v1059_v7 = vld [vmem:[%s2996_s8 + $0xd0] sm:$0xff]  ;;  %v1073_v8 = vld [vmem:[%s2996_s8 + $0x140] sm:$0xff] }
 0x30a   :  { %v939_v13 = vpop.f32.mrf.mxu0  ;;  %v1058_v10 = vld [vmem:[%s2996_s8 + $0xc8] sm:$0xff]  ;;  %1137 = vmatpush.msrb.mxu0 %v1074_v5  ;;  %1090 = vmatpush.msrb.mxu3 %v1043_v28  ;;  %v1169_v5 = vld [vmem:[%s2997_s9 + $0x40] sm:$0xff]  ;;  %v1168_v28 = vld [vmem:[%s2997_s9 + $0x38] sm:$0xff] }
 0x30b   :  { %958 = vst.msk [vmem:[#allocation2] sm:$0xff] %vm957_vm13, %v951_v11  ;;  %1113 = vmatpush.msra.mxu2 %v1059_v7  ;;  %v1072_v11 = vld [vmem:[%s2996_s8 + $0x138] sm:$0xff]  ;;  %v1167_v7 = vld [vmem:[%s2997_s9 + $0x30] sm:$0xff] }
 0x30c   :  { %1138 = vmatpush.msrb.mxu0 %v1073_v8  ;;  %v1166_v8 = vld [vmem:[%s2997_s9 + $0x28] sm:$0xff] }
 0x30d   :  { %1114 = vmatpush.msra.mxu2 %v1058_v10  ;;  %v1164_v10 = vld [vmem:[%s2997_s9 + $0x18] sm:$0xff] }
 0x30e   :  { %v813_v6 = vpop.f32.mrf.mxu2  ;;  %1139 = vmatpush.msrb.mxu0 %v1072_v11  ;;  %v1163_v11 = vld [vmem:[%s2997_s9 + $0x10] sm:$0xff] }
 0x30f   :  { %v849_v14 = vadd.f32 %v848_v9, %v813_v6  ;;  %v1042_v9 = vld [vmem:[%s2996_s8 + $0x48] sm:$0xff] }
 0x310   :  { %v851_v15 = vpop.f32.mrf.mxu3  ;;  %v904_v16 = vpop.f32.mrf.mxu1  ;;  %1091 = vmatpush.msrb.mxu3 %v1042_v9  ;;  %v1165_v9 = vld [vmem:[%s2997_s9 + $0x20] sm:$0xff] }
 0x311   :  { %v952_v17 = vmax.f32 %v849_v14, %v937_v12  ;;  %v940_v19 = vadd.f32 %v939_v13, %v904_v16  ;;  %v1041_v12 = vld [vmem:[%s2996_s8 + $0x40] sm:$0xff]  ;;  %v1071_v16 = vld [vmem:[%s2996_s8 + $0x130] sm:$0xff] }
 0x312   :  { %v942_v22 = vpop.f32.mrf.mxu0  ;;  %v1057_v13 = vld [vmem:[%s2996_s8 + $0xc0] sm:$0xff]  ;;  %1092 = vmatpush.msrb.mxu3 %v1041_v12  ;;  %1140 = vmatpush.msrb.mxu0 %v1071_v16 }
 0x313   :  { %959 = vst.msk [vmem:[#allocation2 + $0x8] sm:$0xff] %vm957_vm13, %v952_v17  ;;  %1115 = vmatpush.msra.mxu2 %v1057_v13  ;;  %v1161_v12 = vld [vmem:[%s2997_s9] sm:$0xff] }
 0x316   :  { %v816_v18 = vpop.f32.mrf.mxu2 }
 0x317   :  { %v852_v20 = vadd.f32 %v851_v15, %v816_v18  ;;  %v1040_v18 = vld [vmem:[%s2996_s8 + $0x38] sm:$0xff] }
 0x318   :  { %v907_v21 = vpop.f32.mrf.mxu1  ;;  %v854_v26 = vpop.f32.mrf.mxu3  ;;  %1093 = vmatpush.msrb.mxu3 %v1040_v18 }
 0x319   :  { %v953_v23 = vmax.f32 %v852_v20, %v940_v19  ;;  %v943_v30 = vadd.f32 %v942_v22, %v907_v21  ;;  %v1056_v19 = vld [vmem:[%s2996_s8 + $0xb8] sm:$0xff]  ;;  %v1039_v20 = vld [vmem:[%s2996_s8 + $0x30] sm:$0xff]  ;;  %v1038_v22 = vld [vmem:[%s2996_s8 + $0x28] sm:$0xff] }
 0x31a   :  { %v964_v24 = vld [vmem:[#allocation2] ss:$2 sm:$0xff]  ;;  %v970_v25 = vld [vmem:[#allocation2 + $0x1] ss:$2 sm:$0xff]  ;;  %v945_v35 = vpop.f32.mrf.mxu0  ;;  %v1055_v21 = vld [vmem:[%s2996_s8 + $0xb0] sm:$0xff]  ;;  %1116 = vmatpush.msra.mxu2 %v1056_v19  ;;  %1094 = vmatpush.msrb.mxu3 %v1039_v20 }
 0x31b   :  { %960 = vst.msk [vmem:[#allocation2 + $0x10] sm:$0xff] %vm957_vm13, %v953_v23  ;;  %v975_v27 = vmax.f32 %v964_v24, %v970_v25  ;;  %v1054_v23 = vld [vmem:[%s2996_s8 + $0xa8] sm:$0xff]  ;;  %v1037_v24 = vld [vmem:[%s2996_s8 + $0x20] sm:$0xff] }
 0x31c   :  { %1117 = vmatpush.msra.mxu2 %v1055_v21  ;;  %v1053_v25 = vld [vmem:[%s2996_s8 + $0xa0] sm:$0xff]  ;;  %1095 = vmatpush.msrb.mxu3 %v1038_v22 }
 0x31d   :  { %978 = vst.msk [vmem:[#allocation3] sm:$0xff] %vm957_vm13, %v975_v27 }
 0x31e   :  { %v819_v29 = vpop.f32.mrf.mxu2  ;;  %1118 = vmatpush.msra.mxu2 %v1054_v23  ;;  %1096 = vmatpush.msrb.mxu3 %v1037_v24 }
 0x31f   :  { %v855_v31 = vadd.f32 %v854_v26, %v819_v29  ;;  %v1036_v26 = vld [vmem:[%s2996_s8 + $0x18] sm:$0xff]  ;;  %v1035_v29 = vld [vmem:[%s2996_s8 + $0x10] sm:$0xff] }
 0x320   :  { %v910_v33 = vpop.f32.mrf.mxu1  ;;  %v857_v39 = vpop.f32.mrf.mxu3  ;;  %1119 = vmatpush.msra.mxu2 %v1053_v25  ;;  %1097 = vmatpush.msrb.mxu3 %v1036_v26 }
 0x321   :  { %v954_v32 = vmax.f32 %v855_v31, %v943_v30  ;;  %v946_v44 = vadd.f32 %v945_v35, %v910_v33  ;;  %v1034_v31 = vld [vmem:[%s2996_s8 + $0x8] sm:$0xff]  ;;  %v1033_v35 = vld [vmem:[%s2996_s8] sm:$0xff] }
 0x322   :  { %v948_v36 = vpop.f32.mrf.mxu0  ;;  %1098 = vmatpush.msrb.mxu3 %v1035_v29  ;;  %v1070_v33 = vld [vmem:[%s2996_s8 + $0x128] sm:$0xff] }
 0x323   :  { %961 = vst.msk [vmem:[#allocation2 + $0x18] sm:$0xff] %vm957_vm13, %v954_v32  ;;  %v1052_v32 = vld [vmem:[%s2996_s8 + $0x98] sm:$0xff]  ;;  %1141 = vmatpush.msrb.mxu0 %v1070_v33 }
 0x324   :  { %1099 = vmatpush.msrb.mxu3 %v1034_v31  ;;  %1120 = vmatpush.msra.mxu2 %v1052_v32 }
 0x326   :  { %v822_v40 = vpop.f32.mrf.mxu2  ;;  %1100 = vmatpush.msrb.mxu3 %v1033_v35 }
 0x327   :  { %v858_v45 = vadd.f32 %v857_v39, %v822_v40  ;;  %v1051_v39 = vld [vmem:[%s2996_s8 + $0x90] sm:$0xff]  ;;  %v1050_v40 = vld [vmem:[%s2996_s8 + $0x88] sm:$0xff] }
 0x328   :  { %v913_v50 = vpop.f32.mrf.mxu1  ;;  %v860_v38 = vpop.f32.mrf.mxu3  ;;  %1121 = vmatpush.msra.mxu2 %v1051_v39 }
 0x329   :  { %v955_v42 = vmax.f32 %v858_v45, %v946_v44  ;;  %v949_v34 = vadd.f32 %v948_v36, %v913_v50  ;;  %v1069_v44 = vld [vmem:[%s2996_s8 + $0x120] sm:$0xff]  ;;  %v1176_v50 = vld [vmem:[%s2997_s9 + $0x78] sm:$0xff] }
 0x32a   :  { %v966_v46 = vld [vmem:[#allocation2 + $0x10] ss:$2 sm:$0xff]  ;;  %v972_v47 = vld [vmem:[#allocation2 + $0x11] ss:$2 sm:$0xff]  ;;  %1142 = vmatpush.msrb.mxu0 %v1069_v44  ;;  %1122 = vmatpush.msra.mxu2 %v1050_v40  ;;  %v1049_v45 = vld [vmem:[%s2996_s8 + $0x80] sm:$0xff] }
 0x32b   :  { %962 = vst.msk [vmem:[#allocation2 + $0x20] sm:$0xff] %vm957_vm13, %v955_v42  ;;  %v976_v49 = vmax.f32 %v966_v46, %v972_v47  ;;  %v1068_v42 = vld [vmem:[%s2996_s8 + $0x118] sm:$0xff]  ;;  %v1067_v46 = vld [vmem:[%s2996_s8 + $0x110] sm:$0xff]  ;;  %v1066_v47 = vld [vmem:[%s2996_s8 + $0x108] sm:$0xff]  ;;  %1177 = vmatpush.msra.mxu1 %v1176_v50  ;;  %1214 = vmatpush.msra.mxu3 %v1176_v50 }
 0x32c   :  { %1123 = vmatpush.msra.mxu2 %v1049_v45  ;;  %1143 = vmatpush.msrb.mxu0 %v1068_v42 }
 0x32d   :  { %979 = vst.msk [vmem:[#allocation3 + $0x8] sm:$0xff] %vm957_vm13, %v976_v49  ;;  %v1065_v49 = vld [vmem:[%s2996_s8 + $0x100] sm:$0xff]  ;;  %1178 = vmatpush.msra.mxu1 %v1175_v62  ;;  %1215 = vmatpush.msra.mxu3 %v1175_v62 }
 0x32e   :  { %v825_v51 = vpop.f32.mrf.mxu2  ;;  %1144 = vmatpush.msrb.mxu0 %v1067_v46  ;;  %v1803_v46 = vmov 128.0  }
 0x32f   :  { %v861_v52 = vadd.f32 %v860_v38, %v825_v51  ;;  %v981_v51 = vld [vmem:[#allocation3] sm:$0xff]  ;;  %1179 = vmatpush.msra.mxu1 %v1174_v1  ;;  %1216 = vmatpush.msra.mxu3 %v1174_v1  ;;  %1780 = vrcp.f32 %v1803_v46  ;;  %v1320_v1 = vld [vmem:[%s2999_s13 + $0x58] sm:$0xff] }
 0x330   :  { %1145 = vmatpush.msrb.mxu0 %v1066_v47 }
 0x331   :  { %v956_v54 = vmax.f32 %v861_v52, %v949_v34 }
 0x332   :  { %1146 = vmatpush.msrb.mxu0 %v1065_v49 }
 0x333   :  { %963 = vst.msk [vmem:[#allocation2 + $0x28] sm:$0xff] %vm957_vm13, %v956_v54 }
 0x334   :  { %v984_v55 = vld [vmem:[#allocation3 + $0x3] sm:$0xff] }
 0x335   :  { %v983_v43 = vld [vmem:[#allocation3 + $0x2] sm:$0xff]  ;;  %995 = vrot.lane.b32.xlu1 %v984_v55, %s1799_s29  ;;  %v1781_v47 = vpop.eup %1780 }
 0x336   :  { %991 = vrot.lane.b32.xlu0 %v983_v43, %s1800_s2  ;;  %v985_v48 = vld [vmem:[#allocation3 + $0x4] sm:$0xff]  ;;  %v1198_v49 = vmul.f32 128.0, %v1781_v47  ;;  %vm1202_vm2 = vweird.f32 %v1781_v47 }
 0x337   :  { %v982_v6 = vld [vmem:[#allocation3 + $0x1] sm:$0xff] }
 0x338   :  { %v1199_v50 = vsub.f32 1.0, %v1198_v49 }
 0x33a   :  { %v968_v41 = vld [vmem:[#allocation2 + $0x20] ss:$2 sm:$0xff]  ;;  %v974_v61 = vld [vmem:[#allocation2 + $0x21] ss:$2 sm:$0xff] }
 0x33b   :  { %v977_v63 = vmax.f32 %v968_v41, %v974_v61 }
 0x33d   :  { %980 = vst.msk [vmem:[#allocation3 + $0x10] sm:$0xff] %vm957_vm13, %v977_v63 }
 0x33e   :  { %999 = vrot.lane.b32.xlu0 %v985_v48, %s1801_s6  ;;  %v1173_v48 = vld [vmem:[%s2997_s9 + $0x60] sm:$0xff] }
 0x33f   :  { %1180 = vmatpush.msra.mxu1 %v1173_v48  ;;  %1217 = vmatpush.msra.mxu3 %v1173_v48  ;;  %v1359_v48 = vld [vmem:[%s3000_s14 + $0x58] sm:$0xff] }
 0x341   :  { %1181 = vmatpush.msra.mxu1 %v1172_v2  ;;  %1218 = vmatpush.msra.mxu3 %v1172_v2  ;;  %v1319_v2 = vld [vmem:[%s2999_s13 + $0x50] sm:$0xff] }
 0x343   :  { %1182 = vmatpush.msra.mxu1 %v1171_v3  ;;  %1219 = vmatpush.msra.mxu3 %v1171_v3  ;;  %v1358_v3 = vld [vmem:[%s3000_s14 + $0x50] sm:$0xff] }
 0x344   :  { %v1011_v14 = vld [vmem:[#allocation3 + $0xf] sm:$0xff] }
 0x345   :  { %v1009_v15 = vld [vmem:[#allocation3 + $0xd] sm:$0xff]  ;;  %1022 = vrot.lane.b32.xlu1 %v1011_v14, %s1799_s29  ;;  %1183 = vmatpush.msra.mxu1 %v1170_v4  ;;  %s1806_s29 = smov 20  }
 0x346   :  { %v1767_v17 = vpack.i.bf16 %v1009_v15, %v982_v6  ;;  %v1010_v27 = vld [vmem:[#allocation3 + $0xe] sm:$0xff]  ;;  %1220 = vmatpush.msra.mxu3 %v1170_v4  ;;  %v1162_v6 = vld [vmem:[%s2997_s9 + $0x8] sm:$0xff] }
 0x347   :  { %v1012_v30 = vld [vmem:[#allocation3 + $0x10] sm:$0xff]  ;;  %1184 = vmatpush.msra.mxu1 %v1169_v5  ;;  %v1318_v4 = vld [vmem:[%s2999_s13 + $0x48] sm:$0xff] }
 0x348   :  { %1768 = vrot.lane.b32.xlu2 %v1767_v17, %s1802_s30  ;;  %v1008_v37 = vld [vmem:[#allocation3 + $0xc] sm:$0xff]  ;;  %1221 = vmatpush.msra.mxu3 %v1169_v5  ;;  %v1357_v5 = vld [vmem:[%s3000_s14 + $0x48] sm:$0xff] }
 0x349   :  { %1185 = vmatpush.msra.mxu1 %v1168_v28 }
 0x34a   :  { %1222 = vmatpush.msra.mxu3 %v1168_v28  ;;  %v1317_v28 = vld [vmem:[%s2999_s13 + $0x40] sm:$0xff] }
 0x34b   :  { %1186 = vmatpush.msra.mxu1 %v1167_v7 }
 0x34c   :  { %1223 = vmatpush.msra.mxu3 %v1167_v7  ;;  %v1356_v7 = vld [vmem:[%s3000_s14 + $0x40] sm:$0xff] }
 0x34d   :  { %1187 = vmatpush.msra.mxu1 %v1166_v8 }
 0x34e   :  { %1224 = vmatpush.msra.mxu3 %v1166_v8 }
 0x34f   :  { %1188 = vmatpush.msra.mxu1 %v1165_v9 }
 0x350   :  { %1018 = vrot.lane.b32.xlu2 %v1010_v27, %s1800_s2  ;;  %1225 = vmatpush.msra.mxu3 %v1165_v9  ;;  %v1316_v9 = vld [vmem:[%s2999_s13 + $0x38] sm:$0xff] }
 0x351   :  { %1189 = vmatpush.msra.mxu1 %v1164_v10 }
 0x352   :  { %1226 = vmatpush.msra.mxu3 %v1164_v10  ;;  %v1355_v10 = vld [vmem:[%s3000_s14 + $0x38] sm:$0xff] }
 0x353   :  { %1190 = vmatpush.msra.mxu1 %v1163_v11 }
 0x354   :  { %1227 = vmatpush.msra.mxu3 %v1163_v11 }
 0x355   :  { %1191 = vmatpush.msra.mxu1 %v1162_v6 }
 0x356   :  { %1228 = vmatpush.msra.mxu3 %v1162_v6  ;;  %v1315_v6 = vld [vmem:[%s2999_s13 + $0x30] sm:$0xff] }
 0x357   :  { %1192 = vmatpush.msra.mxu1 %v1161_v12 }
 0x358   :  { %1026 = vrot.lane.b32.xlu2 %v1012_v30, %s1801_s6  ;;  %1229 = vmatpush.msra.mxu3 %v1161_v12  ;;  %v1354_v12 = vld [vmem:[%s3000_s14 + $0x30] sm:$0xff] }
 0x3a2   :  { %v1769_v36 = vpop.permute.xlu2 %1768 }
 0x3a3   :  { %v1770_v38 = vunpack.i.l.bf16 %v1769_v36  ;;  %v1771_v55 = vunpack.i.h.bf16 %v1769_v36  ;;  %v1200_v36 = vmul.f32 %v1781_v47, %v1199_v50 }
 0x3a5   :  { %v1002_v34 = vsel %vm957_vm13, %v981_v51, %v1770_v38  ;;  %v1029_v57 = vsel %vm957_vm13, %v1008_v37, %v1771_v55  ;;  %v1254_v51 = vld [vmem:[%s2998_s10 + $0x8] sm:$0xff]  ;;  %v1323_v37 = vld [vmem:[%s2999_s13 + $0x70] sm:$0xff]  ;;  %vm1622_vm13 = vcmask 74752  }
 0x3a6   :  { %1101 = vmatmul.f32.vlgmr.msrb.gmra.mxu3 %v1002_v34  ;;  %1298 = vmatpush.msrb.mxu1 %v1254_v51 }
 0x3a7   :  { %v996_v52 = vpop.permute.xlu1 %995  ;;  %1272 = vmatpush.msrb.mxu3 %v1254_v51 }
 0x3a8   :  { %v992_v54 = vpop.permute.xlu0 %991 }
 0x3a9   :  { %v1003_v43 = vsel %vm432_vm6, %v1770_v38, %v992_v54  ;;  %v1201_v38 = vadd.f32 %v1781_v47, %v1200_v36  ;;  %v1253_v54 = vld [vmem:[%s2998_s10] sm:$0xff] }
 0x3aa   :  { %v1005_v56 = vsel %vm1004_vm14, %v1003_v43, %v996_v52  ;;  %v1019_v58 = vpop.permute.xlu2 %1018  ;;  %1273 = vmatpush.msrb.mxu3 %v1253_v54  ;;  %1299 = vmatpush.msrb.mxu1 %v1253_v54  ;;  %v1324_v43 = vld [vmem:[%s2999_s13 + $0x78] sm:$0xff] }
 0x3ab   :  { %1124 = vmatmul.f32.vlgmr.msra.gmra.mxu2 %v1005_v56  ;;  %v1030_v60 = vsel %vm432_vm6, %v1771_v55, %v1019_v58  ;;  %v1363_v56 = vld [vmem:[%s3000_s14 + $0x78] sm:$0xff]  ;;  %v1362_v58 = vld [vmem:[%s3000_s14 + $0x70] sm:$0xff] }
 0x3ac   :  { %1325 = vmatpush.msrb.mxu2 %v1324_v43  ;;  %1364 = vmatpush.msra.mxu0 %v1363_v56  ;;  %v1445_v54 = vld [vmem:[%s3003_s15 + $0xf8] sm:$0xff]  ;;  %v1427_v43 = vld [vmem:[%s3003_s15 + $0x68] sm:$0xff] }
 0x3ad   :  { %v1443_v56 = vld [vmem:[%s3003_s15 + $0xe8] sm:$0xff] }
 0x3ae   :  { %1104 = vmatmul.f32.gmra.mxu3 %v1029_v57  ;;  %1326 = vmatpush.msrb.mxu2 %v1323_v37 }
 0x3af   :  { %1365 = vmatpush.msra.mxu0 %v1362_v58  ;;  %v1426_v58 = vld [vmem:[%s3003_s15 + $0x60] sm:$0xff] }
 0x3b0   :  { %v1000_v59 = vpop.permute.xlu0 %999 }
 0x3b1   :  { %v1007_v53 = vsel %vm1006_vm15, %v996_v52, %v1000_v59  ;;  %v1203_v52 = vsel %vm1202_vm2, %v1781_v47, %v1201_v38  ;;  %vm1661_vm2 = vcmask 80896  }
 0x3b2   :  { %1710 = vmatmul.msk.f32.vlgmr.msrb.gmra.mxu0 %vm1078_vm1, %v1007_v53  ;;  %v1027_v41 = vpop.permute.xlu2 %1026 }
 0x3b7   :  { %v1023_v61 = vpop.permute.xlu1 %1022 }
 0x3b8   :  { %v1031_v63 = vsel %vm1004_vm14, %v1030_v60, %v1023_v61  ;;  %v1032_v0 = vsel %vm1006_vm15, %v1023_v61, %v1027_v41  ;;  %v1322_v60 = vld [vmem:[%s2999_s13 + $0x68] sm:$0xff] }
 0x3b9   :  { %1127 = vmatmul.f32.gmra.mxu2 %v1031_v63  ;;  %v1361_v41 = vld [vmem:[%s3000_s14 + $0x68] sm:$0xff]  ;;  %v1321_v63 = vld [vmem:[%s2999_s13 + $0x60] sm:$0xff] }
 0x3ba   :  { %1711 = vmatmul.msk.f32.gmra.mxu0 %vm1078_vm1, %v1032_v0  ;;  %v1360_v0 = vld [vmem:[%s3000_s14 + $0x60] sm:$0xff]  ;;  %1327 = vmatpush.msrb.mxu2 %v1322_v60  ;;  %v1441_v60 = vld [vmem:[%s3003_s15 + $0xd8] sm:$0xff] }
 0x3bb   :  { %1366 = vmatpush.msra.mxu0 %v1361_v41  ;;  %v1424_v41 = vld [vmem:[%s3003_s15 + $0x50] sm:$0xff] }
 0x3bc   :  { %1328 = vmatpush.msrb.mxu2 %v1321_v63  ;;  %v1423_v63 = vld [vmem:[%s3003_s15 + $0x48] sm:$0xff] }
 0x3bd   :  { %1367 = vmatpush.msra.mxu0 %v1360_v0  ;;  %v1439_v0 = vld [vmem:[%s3003_s15 + $0xc8] sm:$0xff] }
 0x3be   :  { %1329 = vmatpush.msrb.mxu2 %v1320_v1 }
 0x3bf   :  { %1368 = vmatpush.msra.mxu0 %v1359_v48 }
 0x3c0   :  { %1330 = vmatpush.msrb.mxu2 %v1319_v2  ;;  %v1422_v2 = vld [vmem:[%s3003_s15 + $0x40] sm:$0xff] }
 0x3c1   :  { %1369 = vmatpush.msra.mxu0 %v1358_v3  ;;  %v1438_v3 = vld [vmem:[%s3003_s15 + $0xc0] sm:$0xff] }
 0x3c2   :  { %1331 = vmatpush.msrb.mxu2 %v1318_v4  ;;  %v1421_v4 = vld [vmem:[%s3003_s15 + $0x38] sm:$0xff] }
 0x3c3   :  { %1370 = vmatpush.msra.mxu0 %v1357_v5  ;;  %v1437_v5 = vld [vmem:[%s3003_s15 + $0xb8] sm:$0xff] }
 0x3c4   :  { %1332 = vmatpush.msrb.mxu2 %v1317_v28  ;;  %v1420_v28 = vld [vmem:[%s3003_s15 + $0x30] sm:$0xff] }
 0x3c5   :  { %1371 = vmatpush.msra.mxu0 %v1356_v7  ;;  %v1436_v7 = vld [vmem:[%s3003_s15 + $0xb0] sm:$0xff] }
 0x3c6   :  { %1333 = vmatpush.msrb.mxu2 %v1316_v9  ;;  %v1435_v9 = vld [vmem:[%s3003_s15 + $0xa8] sm:$0xff] }
 0x3c7   :  { %1372 = vmatpush.msra.mxu0 %v1355_v10  ;;  %v1418_v10 = vld [vmem:[%s3003_s15 + $0x20] sm:$0xff] }
 0x3c8   :  { %1334 = vmatpush.msrb.mxu2 %v1315_v6 }
 0x3c9   :  { %1373 = vmatpush.msra.mxu0 %v1354_v12 }
 0x429   :  { %v1102_v13 = vpop.f32.mrf.mxu3 }
 0x42e   :  { %v1125_v14 = vpop.f32.mrf.mxu2 }
 0x42f   :  { %v1148_v15 = vpop.f32.mrf.mxu0  ;;  %v1126_v16 = vadd.f32 %v1125_v14, %v1102_v13 }
 0x431   :  { %v1105_v17 = vpop.f32.mrf.mxu3  ;;  %v2664_v19 = vadd.f32 %v1148_v15, %v1126_v16 }
 0x433   :  { %v1205_v23 = vmul.f32 %v2664_v19, %v2664_v19 }
 0x437   :  { %v1151_v21 = vpop.f32.mrf.mxu0 }
 0x43c   :  { %v1128_v18 = vpop.f32.mrf.mxu2 }
 0x43d   :  { %v1129_v20 = vadd.f32 %v1128_v18, %v1105_v17  ;;  %v1248_v17 = vld [vmem:[%s3001_s11] sm:$0x1] }
 0x43f   :  { %v2666_v22 = vadd.f32 %v1151_v21, %v1129_v20  ;;  %v1250_v21 = vld [vmem:[%s3002_s12] sm:$0x1] }
 0x441   :  { %v1154_v24 = vadd.f32 %v2666_v22, %v2664_v19  ;;  %v1206_v25 = vmul.f32 %v2666_v22, %v2666_v22 }
 0x443   :  { %v1155_v26 = vrot.slane %v1154_v24, 4  ;;  %v1207_v27 = vadd.f32 %v1206_v25, %v1205_v23  ;;  %v1314_v25 = vld [vmem:[%s2999_s13 + $0x28] sm:$0xff] }
 0x444   :  { %1335 = vmatpush.msrb.mxu2 %v1314_v25  ;;  %v1430_v25 = vld [vmem:[%s3003_s15 + $0x80] sm:$0xff] }
 0x445   :  { %v1156_v29 = vadd.f32 %v1155_v26, %v1154_v24  ;;  %v1208_v30 = vrot.slane %v1207_v27, 4  ;;  %v1353_v26 = vld [vmem:[%s3000_s14 + $0x28] sm:$0xff] }
 0x446   :  { %1374 = vmatpush.msra.mxu0 %v1353_v26 }
 0x447   :  { %v1157_v31 = vrot.slane %v1156_v29, 2  ;;  %v1209_v32 = vadd.f32 %v1208_v30, %v1207_v27  ;;  %v1313_v27 = vld [vmem:[%s2999_s13 + $0x20] sm:$0xff]  ;;  %v1312_v30 = vld [vmem:[%s2999_s13 + $0x18] sm:$0xff] }
 0x448   :  { %1336 = vmatpush.msrb.mxu2 %v1313_v27 }
 0x449   :  { %v1158_v33 = vadd.f32 %v1157_v31, %v1156_v29  ;;  %v1210_v35 = vrot.slane %v1209_v32, 2  ;;  %v1352_v29 = vld [vmem:[%s3000_s14 + $0x20] sm:$0xff]  ;;  %v1351_v31 = vld [vmem:[%s3000_s14 + $0x18] sm:$0xff] }
 0x44a   :  { %1375 = vmatpush.msra.mxu0 %v1352_v29  ;;  %1337 = vmatpush.msrb.mxu2 %v1312_v30 }
 0x44b   :  { %v1159_v39 = vrot.slane %v1158_v33, 1  ;;  %v1211_v40 = vadd.f32 %v1210_v35, %v1209_v32  ;;  %v1311_v32 = vld [vmem:[%s2999_s13 + $0x10] sm:$0xff]  ;;  %v1310_v35 = vld [vmem:[%s2999_s13 + $0x8] sm:$0xff] }
 0x44c   :  { %1376 = vmatpush.msra.mxu0 %v1351_v31  ;;  %1338 = vmatpush.msrb.mxu2 %v1311_v32 }
 0x44d   :  { %v1160_v44 = vadd.f32 %v1159_v39, %v1158_v33  ;;  %v1212_v45 = vrot.slane %v1211_v40, 1  ;;  %v1350_v33 = vld [vmem:[%s3000_s14 + $0x10] sm:$0xff]  ;;  %v1349_v39 = vld [vmem:[%s3000_s14 + $0x8] sm:$0xff] }
 0x44e   :  { %1377 = vmatpush.msra.mxu0 %v1350_v33  ;;  %1339 = vmatpush.msrb.mxu2 %v1310_v35  ;;  %v1805_v33 = vmov 2.0   ;;  %v1551_v35 = vld [vmem:[%s3007_s18 + $0x70] sm:$0xff] }
 0x44f   :  { %1193 = vmatmul.f32.vlgmr.msra.gmra.mxu1 %v1160_v44  ;;  %v1213_v42 = vadd.f32 %v1212_v45, %v1211_v40  ;;  %v1309_v40 = vld [vmem:[%s2999_s13] sm:$0xff] }
 0x450   :  { %1378 = vmatpush.msra.mxu0 %v1349_v39  ;;  %v1348_v44 = vld [vmem:[%s3000_s14] sm:$0xff]  ;;  %1340 = vmatpush.msrb.mxu2 %v1309_v40  ;;  %v1550_v39 = vld [vmem:[%s3007_s18 + $0x68] sm:$0xff] }
 0x451   :  { %1230 = vmatmul.f32.vlgmr.msra.gmra.mxu3 %v1213_v42  ;;  %v1549_v40 = vld [vmem:[%s3007_s18 + $0x60] sm:$0xff] }
 0x452   :  { %1379 = vmatpush.msra.mxu0 %v1348_v44  ;;  %1466 = vmatpush.msra.mxu3 %v1445_v54  ;;  %v1544_v54 = vld [vmem:[%s3007_s18 + $0x38] sm:$0xff] }
 0x453   :  { %1561 = vmatpush.msra.mxu2 %v1551_v35 }
 0x455   :  { %1562 = vmatpush.msra.mxu2 %v1550_v39 }
 0x457   :  { %1563 = vmatpush.msra.mxu2 %v1549_v40  ;;  %v1583_v40 = vld [vmem:[%s3008_s20 + $0x10] sm:$0xff] }
 0x4cc   :  { %v1194_v34 = vpop.f32.mrf.mxu1 }
 0x4cd   :  { %v1204_v55 = vmul.f32 %v1203_v52, %v1194_v34 }
 0x4cf   :  { %v1235_v59 = vmul.f32 %v1204_v55, %v1204_v55 }
 0x4d4   :  { %v1231_v57 = vpop.f32.mrf.mxu3 }
 0x4d5   :  { %v1234_v53 = vmul.f32 %v1231_v57, %v1203_v52  ;;  %v1429_v52 = vld [vmem:[%s3003_s15 + $0x78] sm:$0xff] }
 0x4d6   :  { %1446 = vmatpush.msra.mxu1 %v1429_v52 }
 0x4d7   :  { %v1236_v61 = vsub.f32 %v1234_v53, %v1235_v59  ;;  %v1442_v59 = vld [vmem:[%s3003_s15 + $0xe0] sm:$0xff]  ;;  %v1425_v53 = vld [vmem:[%s3003_s15 + $0x58] sm:$0xff] }
 0x4d9   :  { %v1237_v62 = vadd.f32 1e-05, %v1236_v61  ;;  %v1440_v61 = vld [vmem:[%s3003_s15 + $0xd0] sm:$0xff] }
 0x4db   :  { %1782 = vrsqrt.f32 %v1237_v62  ;;  %vm1244_vm5 = vweird.f32 %v1237_v62 }
 0x4dc   :  { %1784 = vrcp.f32 %v1805_v33 }
 0x4e1   :  { %v1783_v8 = vpop.eup %1782 }
 0x4e2   :  { %v1239_v11 = vmul.f32 %v1783_v8, %v1237_v62  ;;  %vm1245_vm3 = vweird.f32 %v1783_v8  ;;  %v1785_v44 = vpop.eup %1784 }
 0x4e3   :  { %vm1246_vm7 = vmor %vm1244_vm5, %vm1245_vm3  ;;  %vm1499_vm9 = vweird.f32 %v1785_v44  ;;  %vm1663_vm3 = vcmask 162816   ;;  %vm1665_vm5 = vcmask 244736  }
 0x4e4   :  { %v1240_v13 = vmul.f32 %v1783_v8, %v1239_v11  ;;  %v1434_v11 = vld [vmem:[%s3003_s15 + $0xa0] sm:$0xff] }
 0x4e6   :  { %v1241_v14 = vmul.f32 0.5, %v1240_v13 }
 0x4e8   :  { %v1242_v15 = vsub.f32 1.5, %v1241_v14  ;;  %v1417_v14 = vld [vmem:[%s3003_s15 + $0x18] sm:$0xff] }
 0x4ea   :  { %v1243_v16 = vmul.f32 %v1783_v8, %v1242_v15  ;;  %v1433_v15 = vld [vmem:[%s3003_s15 + $0x98] sm:$0xff] }
 0x4ec   :  { %v1247_v18 = vsel %vm1246_vm7, %v1783_v8, %v1243_v16  ;;  %v1419_v8 = vld [vmem:[%s3003_s15 + $0x28] sm:$0xff]  ;;  %v1416_v16 = vld [vmem:[%s3003_s15 + $0x10] sm:$0xff]  ;;  %vm1667_vm7 = vcmask 932864  }
 0x4ed   :  { %v1249_v20 = vmul.f32 %v1248_v17, %v1247_v18  ;;  %v1432_v17 = vld [vmem:[%s3003_s15 + $0x90] sm:$0xff]  ;;  %v1415_v18 = vld [vmem:[%s3003_s15 + $0x8] sm:$0xff] }
 0x4ef   :  { %v1251_v23 = vmul.f32 %v1249_v20, %v1204_v55  ;;  %1712 = vmatmul.msk.f32.vlgmr.msrb.gmra.mxu3 %vm432_vm6, %v1249_v20  ;;  %v1444_v55 = vld [vmem:[%s3003_s15 + $0xf0] sm:$0xff]  ;;  %v1431_v20 = vld [vmem:[%s3003_s15 + $0x88] sm:$0xff] }
 0x4f0   :  { %1467 = vmatpush.msra.mxu3 %v1444_v55 }
 0x4f1   :  { %v1252_v24 = vsub.f32 %v1250_v21, %v1251_v23 }
 0x4f2   :  { %1468 = vmatpush.msra.mxu3 %v1443_v56 }
 0x4f3   :  { %1713 = vmatmul.msk.f32.vlgmr.msrb.gmra.mxu1 %vm432_vm6, %v1252_v24  ;;  %vm1389_vm6 = vcmask 523264   ;;  %v1414_v24 = vld [vmem:[%s3003_s15] sm:$0xff] }
 0x4f4   :  { %1469 = vmatpush.msra.mxu3 %v1442_v59 }
 0x4f6   :  { %1470 = vmatpush.msra.mxu3 %v1441_v60  ;;  %v1541_v60 = vld [vmem:[%s3007_s18 + $0x20] sm:$0xff] }
 0x4f8   :  { %1471 = vmatpush.msra.mxu3 %v1440_v61 }
 0x4fa   :  { %1472 = vmatpush.msra.mxu3 %v1439_v0 }
 0x4fc   :  { %1473 = vmatpush.msra.mxu3 %v1438_v3 }
 0x4fe   :  { %1474 = vmatpush.msra.mxu3 %v1437_v5 }
 0x500   :  { %1475 = vmatpush.msra.mxu3 %v1436_v7  ;;  %v1537_v7 = vld [vmem:[%s3007_s18] sm:$0xff] }
 0x502   :  { %1476 = vmatpush.msra.mxu3 %v1435_v9 }
 0x504   :  { %1477 = vmatpush.msra.mxu3 %v1434_v11  ;;  %v1590_v11 = vld [vmem:[%s3008_s20 + $0x48] sm:$0xff] }
 0x506   :  { %1478 = vmatpush.msra.mxu3 %v1433_v15  ;;  %v1587_v15 = vld [vmem:[%s3008_s20 + $0x30] sm:$0xff] }
 0x508   :  { %1479 = vmatpush.msra.mxu3 %v1432_v17  ;;  %v1585_v17 = vld [vmem:[%s3008_s20 + $0x20] sm:$0xff] }
 0x50a   :  { %1480 = vmatpush.msra.mxu3 %v1431_v20  ;;  %v1584_v20 = vld [vmem:[%s3008_s20 + $0x18] sm:$0xff] }
 0x50c   :  { %1481 = vmatpush.msra.mxu3 %v1430_v25 }
 0x570   :  { %v1301_v45 = vpop.f32.mrf.mxu1 }
 0x571   :  { %v1304_v47 = vperm.slane %v1301_v45, 0  ;;  %v1548_v45 = vld [vmem:[%s3007_s18 + $0x58] sm:$0xff] }
 0x572   :  { %v1275_v42 = vpop.f32.mrf.mxu3  ;;  %1564 = vmatpush.msra.mxu2 %v1548_v45  ;;  %v1581_v45 = vld [vmem:[%s3008_s20] sm:$0xff] }
 0x573   :  { %v1278_v46 = vperm.slane %v1275_v42, 0  ;;  %v1495_v42 = vmul.f32 2.0, %v1785_v44 }
 0x575   :  { %v1279_v49 = vmul.f32 %v1278_v46, %v2664_v19  ;;  %v1280_v36 = vmul.f32 %v1278_v46, %v2666_v22  ;;  %v1428_v19 = vld [vmem:[%s3003_s15 + $0x70] sm:$0xff] }
 0x576   :  { %1447 = vmatpush.msra.mxu1 %v1428_v19  ;;  %v1547_v46 = vld [vmem:[%s3007_s18 + $0x50] sm:$0xff] }
 0x577   :  { %v1305_v50 = vadd.f32 %v1304_v47, %v1279_v49  ;;  %v1306_v51 = vadd.f32 %v1304_v47, %v1280_v36  ;;  %1565 = vmatpush.msra.mxu2 %v1547_v46  ;;  %v1546_v47 = vld [vmem:[%s3007_s18 + $0x48] sm:$0xff] }
 0x578   :  { %1448 = vmatpush.msra.mxu1 %v1427_v43  ;;  %v1543_v43 = vld [vmem:[%s3007_s18 + $0x30] sm:$0xff] }
 0x579   :  { %v1307_v38 = vmax.f32 %v1305_v50, 0.0  ;;  %v1308_v34 = vmax.f32 %v1306_v51, 0.0  ;;  %1566 = vmatpush.msra.mxu2 %v1546_v47  ;;  %v1545_v51 = vld [vmem:[%s3007_s18 + $0x40] sm:$0xff] }
 0x57a   :  { %1449 = vmatpush.msra.mxu1 %v1426_v58 }
 0x57b   :  { %1341 = vmatmul.f32.vlgmr.msrb.gmra.mxu2 %v1307_v38  ;;  %1380 = vmatmul.f32.vlgmr.msra.gmra.mxu0 %v1307_v38  ;;  %v1496_v38 = vsub.f32 1.0, %v1495_v42  ;;  %v1774_v42 = vld [vmem:[%s3006_s19] ss:$0 sm:$0xff]  ;;  %s1807_s19 = smov 10  }
 0x57c   :  { %1450 = vmatpush.msra.mxu1 %v1425_v53  ;;  %1567 = vmatpush.msra.mxu2 %v1545_v51 }
 0x57e   :  { %1451 = vmatpush.msra.mxu1 %v1424_v41  ;;  %1568 = vmatpush.msra.mxu2 %v1544_v54 }
 0x580   :  { %1452 = vmatpush.msra.mxu1 %v1423_v63  ;;  %1569 = vmatpush.msra.mxu2 %v1543_v43  ;;  %v1540_v63 = vld [vmem:[%s3007_s18 + $0x18] sm:$0xff] }
 0x582   :  { %1453 = vmatpush.msra.mxu1 %v1422_v2 }
 0x583   :  { %1344 = vmatmul.f32.gmra.mxu2 %v1308_v34  ;;  %1383 = vmatmul.f32.gmra.mxu0 %v1308_v34 }
 0x584   :  { %1454 = vmatpush.msra.mxu1 %v1421_v4  ;;  %v1538_v4 = vld [vmem:[%s3007_s18 + $0x8] sm:$0xff] }
 0x586   :  { %1455 = vmatpush.msra.mxu1 %v1420_v28 }
 0x588   :  { %1456 = vmatpush.msra.mxu1 %v1419_v8 }
 0x58a   :  { %1457 = vmatpush.msra.mxu1 %v1418_v10  ;;  %v1591_v10 = vld [vmem:[%s3008_s20 + $0x50] sm:$0xf] }
 0x58b   :  { %1715 = vmatpush.msk.msrb.mxu0 %vm274_vm0, %v1591_v10 }
 0x58c   :  { %1458 = vmatpush.msra.mxu1 %v1417_v14  ;;  %v1588_v14 = vld [vmem:[%s3008_s20 + $0x38] sm:$0xff] }
 0x58d   :  { %1608 = vmatpush.msrb.mxu0 %v1590_v11 }
 0x58e   :  { %1459 = vmatpush.msra.mxu1 %v1416_v16  ;;  %v1586_v16 = vld [vmem:[%s3008_s20 + $0x28] sm:$0xff] }
 0x590   :  { %1460 = vmatpush.msra.mxu1 %v1415_v18 }
 0x592   :  { %1461 = vmatpush.msra.mxu1 %v1414_v24 }
 0x5f8   :  { %v1381_v22 = vpop.f32.mrf.mxu0 }
 0x5fe   :  { %v1342_v37 = vpop.f32.mrf.mxu2 }
 0x5ff   :  { %v1387_v57 = vmax.f32 %v1342_v37, %v1381_v22  ;;  %v1497_v22 = vmul.f32 %v1785_v44, %v1496_v38 }
 0x600   :  { %v1384_v62 = vpop.f32.mrf.mxu0 }
 0x601   :  { %1390 = vst.msk [vmem:[#allocation4] sm:$0xff] %vm1389_vm6, %v1387_v57  ;;  %v1542_v57 = vld [vmem:[%s3007_s18 + $0x28] sm:$0xff]  ;;  %v1498_v53 = vadd.f32 %v1785_v44, %v1497_v22 }
 0x602   :  { %1570 = vmatpush.msra.mxu2 %v1542_v57 }
 0x604   :  { %1571 = vmatpush.msra.mxu2 %v1541_v60 }
 0x606   :  { %v1345_v1 = vpop.f32.mrf.mxu2  ;;  %1572 = vmatpush.msra.mxu2 %v1540_v63 }
 0x607   :  { %v1388_v48 = vmax.f32 %v1345_v1, %v1384_v62  ;;  %v1500_v1 = vsel %vm1499_vm9, %v1785_v44, %v1498_v53  ;;  %v1582_v44 = vld [vmem:[%s3008_s20 + $0x8] sm:$0xff] }
 0x609   :  { %1391 = vst.msk [vmem:[#allocation4 + $0x8] sm:$0xff] %vm1389_vm6, %v1388_v48  ;;  %v1539_v48 = vld [vmem:[%s3007_s18 + $0x10] sm:$0xff] }
 0x60a   :  { %1573 = vmatpush.msra.mxu2 %v1539_v48 }
 0x60c   :  { %1574 = vmatpush.msra.mxu2 %v1538_v4 }
 0x60e   :  { %1575 = vmatpush.msra.mxu2 %v1537_v7 }
 0x610   :  { %v1392_v6 = vld [vmem:[#allocation4] ss:$2 sm:$0xff]  ;;  %v1394_v12 = vld [vmem:[#allocation4 + $0x1] ss:$2 sm:$0xff] }
 0x611   :  { %v1395_v13 = vmax.f32 %v1392_v6, %v1394_v12  ;;  %v1589_v12 = vld [vmem:[%s3008_s20 + $0x40] sm:$0xff]  ;;  %s1808_s20 = smov 30  }
 0x612   :  { %1609 = vmatpush.msrb.mxu0 %v1589_v12 }
 0x613   :  { %1396 = vst.msk [vmem:[#allocation5] sm:$0xff] %vm1389_vm6, %v1395_v13 }
 0x614   :  { %1610 = vmatpush.msrb.mxu0 %v1588_v14 }
 0x616   :  { %1611 = vmatpush.msrb.mxu0 %v1587_v15 }
 0x618   :  { %1612 = vmatpush.msrb.mxu0 %v1586_v16 }
 0x61a   :  { %v1403_v21 = vld [vmem:[#allocation5 + $0x3] ss:$4 sm:$0x3]  ;;  %v1399_v23 = vld [vmem:[#allocation5 + $0x1] ss:$4 sm:$0x3]  ;;  %1613 = vmatpush.msrb.mxu0 %v1585_v17 }
 0x61b   :  { %1409 = vrot.lane.b32.xlu0 %v1403_v21, %s1804_s25  ;;  %1405 = vrot.lane.b32.xlu1 %v1399_v23, %s1804_s25  ;;  %v1401_v26 = vld [vmem:[#allocation5 + $0x2] ss:$4 sm:$0x3]  ;;  %v1397_v27 = vld [vmem:[#allocation5] ss:$4 sm:$0x3] }
 0x61c   :  { %1614 = vmatpush.msrb.mxu0 %v1584_v20 }
 0x61e   :  { %1615 = vmatpush.msrb.mxu0 %v1583_v40 }
 0x620   :  { %1616 = vmatpush.msrb.mxu0 %v1582_v44 }
 0x622   :  { %1617 = vmatpush.msrb.mxu0 %v1581_v45 }
 0x68d   :  { %v1410_v29 = vpop.permute.xlu0 %1409  ;;  %v1406_v30 = vpop.permute.xlu1 %1405 }
 0x68e   :  { %v1413_v31 = vsel %vm1389_vm6, %v1401_v26, %v1410_v29  ;;  %v1412_v32 = vsel %vm1389_vm6, %v1397_v27, %v1406_v30  ;;  %v1772_v29 = vld [vmem:[%s3004_s16] ss:$0 sm:$0xff] }
 0x68f   :  { %1462 = vmatmul.f32.vlgmr.msra.gmra.mxu1 %v1412_v32  ;;  %1482 = vmatmul.f32.vlgmr.msra.gmra.mxu3 %v1413_v31  ;;  %v1773_v32 = vld [vmem:[%s3005_s17] ss:$0 sm:$0xff] }
 0x70c   :  { %v1463_v49 = vpop.f32.mrf.mxu1 }
 0x712   :  { %v1483_v50 = vpop.f32.mrf.mxu3 }
 0x713   :  { %v2905_v36 = vadd.f32 %v1483_v50, %v1463_v49  ;;  %v1775_v50 = vld [vmem:[%s3009_s21] ss:$0 sm:$0xff] }
 0x715   :  { %v1487_v34 = vsel %vm1486_vm8, %v2905_v36, 0.0  ;;  %v1502_v52 = vmul.f32 %v2905_v36, %v2905_v36 }
 0x716   :  { %v1488_v19 = vrot.slane %v1487_v34, 4 }
 0x717   :  { %v1503_v55 = vsel %vm1486_vm8, %v1502_v52, 0.0 }
 0x718   :  { %v1489_v56 = vadd.f32 %v1488_v19, %v1487_v34  ;;  %v1504_v37 = vrot.slane %v1503_v55, 4 }
 0x71a   :  { %v1490_v58 = vrot.slane %v1489_v56, 2  ;;  %v1505_v59 = vadd.f32 %v1504_v37, %v1503_v55 }
 0x71c   :  { %v1491_v41 = vadd.f32 %v1490_v58, %v1489_v56  ;;  %v1506_v61 = vrot.slane %v1505_v59, 2 }
 0x71e   :  { %v1492_v0 = vrot.slane %v1491_v41, 1  ;;  %v1507_v62 = vadd.f32 %v1506_v61, %v1505_v59 }
 0x720   :  { %v1493_v2 = vadd.f32 %v1492_v0, %v1491_v41  ;;  %v1508_v3 = vrot.slane %v1507_v62, 1 }
 0x722   :  { %v1501_v5 = vmul.f32 %v1500_v1, %v1493_v2  ;;  %v1509_v28 = vadd.f32 %v1508_v3, %v1507_v62 }
 0x724   :  { %v1510_v8 = vmul.f32 %v1509_v28, %v1500_v1  ;;  %v1511_v9 = vmul.f32 %v1501_v5, %v1501_v5  ;;  %v1513_v27 = vsub.f32 %v2905_v36, %v1501_v5 }
 0x726   :  { %v1512_v6 = vsub.f32 %v1510_v8, %v1511_v9 }
 0x728   :  { %v1514_v13 = vadd.f32 1e-05, %v1512_v6 }
 0x72a   :  { %1786 = vrsqrt.f32 %v1514_v13  ;;  %vm1521_vm10 = vweird.f32 %v1514_v13 }
 0x730   :  { %v1787_v18 = vpop.eup %1786 }
 0x731   :  { %v1516_v21 = vmul.f32 %v1787_v18, %v1514_v13  ;;  %vm1522_vm0 = vweird.f32 %v1787_v18 }
 0x732   :  { %vm1523_vm11 = vmor %vm1521_vm10, %vm1522_vm0 }
 0x733   :  { %v1517_v23 = vmul.f32 %v1787_v18, %v1516_v21 }
 0x735   :  { %v1518_v24 = vmul.f32 0.5, %v1517_v23 }
 0x737   :  { %v1519_v25 = vsub.f32 1.5, %v1518_v24 }
 0x739   :  { %v1520_v26 = vmul.f32 %v1787_v18, %v1519_v25 }
 0x73b   :  { %v1524_v30 = vsel %vm1523_vm11, %v1787_v18, %v1520_v26 }
 0x73c   :  { %v1525_v31 = vmul.f32 %v1524_v30, %v1513_v27 }
 0x73e   :  { %v1530_v33 = vmul.f32 %v1772_v29, %v1525_v31 }
 0x740   :  { %v1535_v35 = vadd.f32 %v1773_v32, %v1530_v33 }
 0x742   :  { %v1536_v39 = vmax.f32 %v1535_v35, 0.0 }
 0x744   :  { %1714 = vmatmul.msk.f32.vlgmr.msra.gmra.mxu2 %vm1556_vm12, %v1536_v39 }
 0x7c7   :  { %v1577_v46 = vpop.f32.mrf.mxu2 }
 0x7c8   :  { %v1578_v47 = vadd.f32 %v1774_v42, %v1577_v46 }
 0x7ca   :  { %v1580_v49 = vmax.f32 %v1578_v47, 0.0 }
 0x7cc   :  { %1716 = vmatmul.msk.f32.vlgmr.msrb.gmra.mxu0 %vm142_vm4, %v1580_v49 }
 0x849   :  { %v1619_v36 = vpop.f32.mrf.mxu0 }
 0x84a   :  { %v1620_v38 = vadd.f32 %v1775_v50, %v1619_v36 }
 0x84c   :  { %1655 = vrot.lane.b32.xlu1 %v1620_v38, %s1806_s29  ;;  %v1623_v51 = vsel %vm1622_vm13, %v1620_v38, -inf }
 0x84d   :  { %1624 = vmax.xlane.f32.xlu2 %v1623_v51 }
 0x8be   :  { %v1656_v0 = vpop.permute.xlu1 %1655 }
 0x8c0   :  { %v1625_v34 = vpop.xlane.xlu2 %1624 }
 0x8c1   :  { %v1626_v52 = vsub.f32 %v1620_v38, %v1625_v34 }
 0x8c3   :  { %v1627_v54 = vmul.f32 1.442695, %v1626_v52 }
 0x8c5   :  { %1788 = vpow2.f32 %v1627_v54 }
 0x8cb   :  { %v1789_v19 = vpop.eup %1788 }
 0x8cc   :  { %v1629_v22 = vsel %vm1622_vm13, %v1789_v19, 0.0 }
 0x8cd   :  { %1630 = vadd.xlane.f32.xlu0 %v1629_v22 }
 0x940   :  { %v1631_v55 = vpop.xlane.xlu0 %1630 }
 0x941   :  { %1790 = vrcp.f32 %v1631_v55  ;;  %v1643_v57 = vand.u32 2147483648, %v1631_v55  ;;  %v1641_v59 = vand.u32 2147483647, %v1631_v55  ;;  %vm1637_vm14 = vweird.f32 %v1631_v55 }
 0x942   :  { %1792 = vlog2.f32 %v1631_v55 }
 0x943   :  { %v1644_v60 = vor.u32 1.1754944e-38, %v1643_v57  ;;  %vm1642_vm1 = vcmp.eq.f32.partialorder %v1641_v59, 8.507059e+37 }
 0x947   :  { %v1791_v43 = vpop.eup %1790 }
 0x948   :  { %v1633_v56 = vmul.f32 %v1791_v43, %v1631_v55  ;;  %vm1638_vm4 = vweird.f32 %v1791_v43  ;;  %v1793_v62 = vpop.eup %1792 }
 0x949   :  { %vm1639_vm15 = vmor %vm1637_vm14, %vm1638_vm4  ;;  %v1648_v1 = vmul.f32 0.6931472, %v1793_v62 }
 0x94a   :  { %v1634_v37 = vsub.f32 1.0, %v1633_v56 }
 0x94b   :  { %v1649_v2 = vsub.f32 %v1626_v52, %v1648_v1 }
 0x94c   :  { %v1635_v58 = vmul.f32 %v1791_v43, %v1634_v37 }
 0x94e   :  { %v1636_v53 = vadd.f32 %v1791_v43, %v1635_v58 }
 0x950   :  { %v1640_v41 = vsel %vm1639_vm15, %v1791_v43, %v1636_v53 }
 0x951   :  { %v1645_v61 = vsel %vm1642_vm1, %v1644_v60, %v1640_v41 }
 0x952   :  { %v1646_v63 = vmul.f32 %v1789_v19, %v1645_v61 }
 0x954   :  { %1651 = vrot.lane.b32.xlu1 %v1646_v63, %s1807_s19 }
 0x95c   :  { %1658 = vrot.lane.b32.xlu1 %v1580_v49, %s1808_s20 }
 0x9c6   :  { %v1652_v48 = vpop.permute.xlu1 %1651 }
 0x9c7   :  { %v1662_v3 = vsel %vm1661_vm2, %v1649_v2, %v1652_v48 }
 0x9c8   :  { %v1664_v4 = vsel %vm1663_vm3, %v1662_v3, %v1656_v0 }
 0x9ce   :  { %v1659_v5 = vpop.permute.xlu1 %1658 }
 0x9cf   :  { %v1666_v28 = vsel %vm1665_vm5, %v1664_v4, %v1659_v5 }
 0x9d0   :  { %v1668_v7 = vsel %vm1667_vm7, %v1666_v28, 0.0 }
 0x9d1   :  { %1669 = vst [vmem:[%s3010_s22] sm:$0x3] %v1668_v7 }

</bundles_post_ra>
